<compile_context>
chip_gen: v7x
topology: tpu7x:2x2x1
jax: 0.10.0
libtpu: 0.0.40
codegen_flags: <defaults>
</compile_context>

<pallas_src>
import functools

import jax
import jax.numpy as jnp
from jax.experimental import pallas as pl
from jax.experimental.pallas import tpu as pltpu

BN_EPS = 1e-5

# Padded layer widths (lane-dense: multiples of 128 where it matters).
D_IN = 28 * 28          # 784
D1 = 512
D2 = 256
D3 = 64                 # logical
D3P = 128               # padded
D_OUT = 10              # logical
D_OUTP = 128            # padded


def _bn_relu(h, gamma, beta):
    """Training-mode BatchNorm1d (batch stats, biased variance) + ReLU, f32.

    One-pass stats: mean = E[h], var = E[h^2] - mean^2 (clamped at 0), so the
    two cross-sublane reductions are independent.
    """
    inv_b = 1.0 / h.shape[0]
    mean = jnp.sum(h, axis=0, keepdims=True) * inv_b
    mean_sq = jnp.sum(h * h, axis=0, keepdims=True) * inv_b
    var = jnp.maximum(mean_sq - mean * mean, 0.0)
    h_hat = (h - mean) * jax.lax.rsqrt(var + BN_EPS)
    return jnp.maximum(h_hat * gamma + beta, 0.0)


def mlp_kernel(x_ref, w1_ref, w2_ref, w3_ref, w4_ref, vec_ref, o_ref):
    # Packed per-layer vectors, all f32, one DMA:
    #   row 0: gamma1[512]   row 1: beta1[512]
    #   row 2: gamma2[:256]  row 3: beta2[:256]
    #   row 4: gamma3[:128]  row 5: beta3[:128]   (cols 64..127 are padding)
    #   row 6: b4[:128]                            (cols 10..127 are zero)
    vec = vec_ref[...]
    g1, be1 = vec[0:1, :], vec[1:2, :]
    g2, be2 = vec[2:3, 0:D2], vec[3:4, 0:D2]
    g3, be3 = vec[4:5, 0:D3P], vec[5:6, 0:D3P]
    b4 = vec[6:7, 0:D_OUTP]

    x = x_ref[...]  # [B, 784] bf16

    # Linear biases b1..b3 omitted: cancelled exactly by the BN mean-subtract.
    h = jnp.dot(x, w1_ref[...], preferred_element_type=jnp.float32)
    h = _bn_relu(h, g1, be1)

    h = jnp.dot(h.astype(jnp.bfloat16), w2_ref[...],
                preferred_element_type=jnp.float32)
    h = _bn_relu(h, g2, be2)

    h = jnp.dot(h.astype(jnp.bfloat16), w3_ref[...],
                preferred_element_type=jnp.float32)
    # Padded cols 64..127 are identically zero -> BN maps them to beta_pad = 0,
    # and W4's corresponding rows are zero, so padding never leaks into logits.
    h = _bn_relu(h, g3, be3)

    out = jnp.dot(h.astype(jnp.bfloat16), w4_ref[...],
                  preferred_element_type=jnp.float32) + b4
    o_ref[...] = out.astype(o_ref.dtype)  # [B, 128] lane-dense store


def init_params(key):
    """Deterministic init mimicking PyTorch defaults (uniform +-1/sqrt(fan_in)).

    b1..b3 are not materialized: under training-mode BN they cancel exactly.
    Weights are padded to lane-dense shapes and stored as bf16 for the MXU.
    """
    k_w1, k_w2, k_w3, k_w4, k_b4 = jax.random.split(key, 5)

    def uni(k, shape, fan_in):
        bound = 1.0 / (fan_in ** 0.5)
        return jax.random.uniform(k, shape, jnp.float32, -bound, bound)

    w1 = uni(k_w1, (D_IN, D1), D_IN)                    # (784, 512)
    w2 = uni(k_w2, (D1, D2), D1)                        # (512, 256)
    w3 = uni(k_w3, (D2, D3), D2)                        # (256, 64)
    w4 = uni(k_w4, (D3, D_OUT), D3)                     # (64, 10)
    b4 = uni(k_b4, (D_OUT,), D3)                        # (10,)

    w3p = jnp.pad(w3, ((0, 0), (0, D3P - D3)))          # (256, 128)
    w4p = jnp.pad(w4, ((0, D3P - D3), (0, D_OUTP - D_OUT)))  # (128, 128)

    params = {
        "w1": w1.astype(jnp.bfloat16),
        "w2": w2.astype(jnp.bfloat16),
        "w3": w3p.astype(jnp.bfloat16),
        "w4": w4p.astype(jnp.bfloat16),
    }

    # Packed per-layer vectors -> single (8, 512) f32 operand.
    vec = jnp.zeros((8, D1), jnp.float32)
    vec = vec.at[0, :D1].set(jnp.ones((D1,), jnp.float32))    # gamma1
    vec = vec.at[1, :D1].set(jnp.zeros((D1,), jnp.float32))   # beta1
    vec = vec.at[2, :D2].set(jnp.ones((D2,), jnp.float32))    # gamma2
    vec = vec.at[3, :D2].set(jnp.zeros((D2,), jnp.float32))   # beta2
    vec = vec.at[4, :D3].set(jnp.ones((D3,), jnp.float32))    # gamma3 (pad=0, harmless)
    vec = vec.at[5, :D3].set(jnp.zeros((D3,), jnp.float32))   # beta3
    vec = vec.at[6, :D_OUT].set(b4)                           # b4 (pad=0)
    params["vec"] = vec
    return params


@functools.partial(jax.jit, static_argnames=())
def neural_network_forward(x_nchw, params):
    B = x_nchw.shape[0]
    # nn.Flatten(); cast to bf16 so the activation DMA + MXU input are native.
    x_flat = x_nchw.reshape(B, -1).astype(jnp.bfloat16)

    operands = (x_flat, params["w1"], params["w2"], params["w3"],
                params["w4"], params["vec"])
    vmem_spec = pl.BlockSpec(memory_space=pltpu.MemorySpace.VMEM)

    flops = 2 * B * (D_IN * D1 + D1 * D2 + D2 * D3P + D3P * D_OUTP)
    bytes_accessed = (sum(int(a.size) * a.dtype.itemsize for a in operands)
                      + B * D_OUTP * 4)

    out_padded = pl.pallas_call(
        mlp_kernel,
        out_shape=jax.ShapeDtypeStruct((B, D_OUTP), jnp.float32),
        in_specs=[vmem_spec] * len(operands),
        out_specs=vmem_spec,
        cost_estimate=pl.CostEstimate(
            flops=flops,
            transcendentals=D1 + D2 + D3P,
            bytes_accessed=bytes_accessed,
        ),
    )(*operands)
    return out_padded[:, :D_OUT]


def _reference_forward(x_nchw, params):
    """Pure-JAX reference with identical casts, for a correctness check."""
    B = x_nchw.shape[0]
    x = x_nchw.reshape(B, -1).astype(jnp.bfloat16)
    vec = params["vec"]

    def bn_relu(h, g, b):
        mean = jnp.mean(h, axis=0, keepdims=True)
        var = jnp.mean((h - mean) ** 2, axis=0, keepdims=True)
        return jnp.maximum((h - mean) * jax.lax.rsqrt(var + BN_EPS) * g + b, 0.0)

    h = jnp.dot(x, params["w1"], preferred_element_type=jnp.float32)
    h = bn_relu(h, vec[0:1, :], vec[1:2, :])
    h = jnp.dot(h.astype(jnp.bfloat16), params["w2"],
                preferred_element_type=jnp.float32)
    h = bn_relu(h, vec[2:3, :D2], vec[3:4, :D2])
    h = jnp.dot(h.astype(jnp.bfloat16), params["w3"],
                preferred_element_type=jnp.float32)
    h = bn_relu(h, vec[4:5, :D3P], vec[5:6, :D3P])
    out = jnp.dot(h.astype(jnp.bfloat16), params["w4"],
                  preferred_element_type=jnp.float32) + vec[6:7, :D_OUTP]
    return out[:, :D_OUT]


if __name__ == "__main__":
    key = jax.random.PRNGKey(0)
    k_params, k_x = jax.random.split(key)

    params = init_params(k_params)
    # Small MNIST-like batch: [B, C, H, W] = [8, 1, 28, 28] (NCHW, like PyTorch).
    x = jax.random.normal(k_x, (8, 1, 28, 28), jnp.float32)

    out = neural_network_forward(x, params)
    out = jax.block_until_ready(out)
    assert out.shape == (8, 10) and out.dtype == jnp.float32

    ref = jax.block_until_ready(_reference_forward(x, params))
    assert jnp.allclose(out, ref, atol=2e-2, rtol=2e-2)

    print("KERNEL_OK")
</pallas_src>

<mosaic_0001>
module attributes {stable_mosaic.version = 11 : i64} {
  func.func @mlp_kernel(%arg0: memref<8x784xbf16, #tpu.memory_space<vmem>>, %arg1: memref<784x512xbf16, #tpu.memory_space<vmem>>, %arg2: memref<512x256xbf16, #tpu.memory_space<vmem>>, %arg3: memref<256x128xbf16, #tpu.memory_space<vmem>>, %arg4: memref<128x128xbf16, #tpu.memory_space<vmem>>, %arg5: memref<8x512xf32, #tpu.memory_space<vmem>>, %arg6: memref<8x128xf32, #tpu.memory_space<vmem>>) attributes {dimension_semantics = [], scalar_prefetch = 0 : i64, scratch_operands = 0 : i64, tpu.core_type = #tpu.core_type<tc>} {
    %c0 = arith.constant 0 : index
    %c0_0 = arith.constant 0 : index
    %0 = vector.load %arg5[%c0, %c0_0] : memref<8x512xf32, #tpu.memory_space<vmem>>, vector<8x512xf32>
    %1 = vector.extract_strided_slice %0 {offsets = [0, 0], sizes = [1, 512], strides = [1, 1]} : vector<8x512xf32> to vector<1x512xf32>
    %2 = vector.extract_strided_slice %0 {offsets = [1, 0], sizes = [1, 512], strides = [1, 1]} : vector<8x512xf32> to vector<1x512xf32>
    %3 = vector.extract_strided_slice %0 {offsets = [2, 0], sizes = [1, 256], strides = [1, 1]} : vector<8x512xf32> to vector<1x256xf32>
    %4 = vector.extract_strided_slice %0 {offsets = [3, 0], sizes = [1, 256], strides = [1, 1]} : vector<8x512xf32> to vector<1x256xf32>
    %5 = vector.extract_strided_slice %0 {offsets = [4, 0], sizes = [1, 128], strides = [1, 1]} : vector<8x512xf32> to vector<1x128xf32>
    %6 = vector.extract_strided_slice %0 {offsets = [5, 0], sizes = [1, 128], strides = [1, 1]} : vector<8x512xf32> to vector<1x128xf32>
    %7 = vector.extract_strided_slice %0 {offsets = [6, 0], sizes = [1, 128], strides = [1, 1]} : vector<8x512xf32> to vector<1x128xf32>
    %c0_1 = arith.constant 0 : index
    %c0_2 = arith.constant 0 : index
    %8 = vector.load %arg0[%c0_1, %c0_2] : memref<8x784xbf16, #tpu.memory_space<vmem>>, vector<8x784xbf16>
    %c0_3 = arith.constant 0 : index
    %c0_4 = arith.constant 0 : index
    %9 = vector.load %arg1[%c0_3, %c0_4] : memref<784x512xbf16, #tpu.memory_space<vmem>>, vector<784x512xbf16>
    %cst = arith.constant dense<0.000000e+00> : vector<8x512xf32>
    %10 = tpu.matmul %8, %9, %cst {dimension_numbers = #tpu.dot_dimension_numbers<[1], [0], [0], [1], [0, 0, 1, 1], [], []>} : vector<8x784xbf16>, vector<784x512xbf16>, vector<8x512xf32> -> vector<8x512xf32>
    %cst_5 = arith.constant dense<0.000000e+00> : vector<512xf32>
    %11 = vector.multi_reduction <add>, %10, %cst_5 [0] : vector<8x512xf32> to vector<512xf32>
    %12 = vector.shape_cast %11 : vector<512xf32> to vector<1x512xf32>
    %cst_6 = arith.constant 1.250000e-01 : f32
    %13 = vector.broadcast %cst_6 : f32 to vector<1x512xf32>
    %14 = arith.mulf %12, %13 : vector<1x512xf32>
    %15 = arith.mulf %10, %10 : vector<8x512xf32>
    %cst_7 = arith.constant dense<0.000000e+00> : vector<512xf32>
    %16 = vector.multi_reduction <add>, %15, %cst_7 [0] : vector<8x512xf32> to vector<512xf32>
    %17 = vector.shape_cast %16 : vector<512xf32> to vector<1x512xf32>
    %cst_8 = arith.constant 1.250000e-01 : f32
    %18 = vector.broadcast %cst_8 : f32 to vector<1x512xf32>
    %19 = arith.mulf %17, %18 : vector<1x512xf32>
    %20 = arith.mulf %14, %14 : vector<1x512xf32>
    %21 = arith.subf %19, %20 : vector<1x512xf32>
    %cst_9 = arith.constant 0.000000e+00 : f32
    %22 = vector.broadcast %cst_9 : f32 to vector<1x512xf32>
    %23 = arith.maximumf %21, %22 : vector<1x512xf32>
    %24 = vector.broadcast %14 : vector<1x512xf32> to vector<8x512xf32>
    %25 = arith.subf %10, %24 : vector<8x512xf32>
    %cst_10 = arith.constant 9.99999974E-6 : f32
    %26 = vector.broadcast %cst_10 : f32 to vector<1x512xf32>
    %27 = arith.addf %23, %26 : vector<1x512xf32>
    %28 = math.rsqrt %27 : vector<1x512xf32>
    %29 = vector.broadcast %28 : vector<1x512xf32> to vector<8x512xf32>
    %30 = arith.mulf %25, %29 : vector<8x512xf32>
    %31 = vector.broadcast %1 : vector<1x512xf32> to vector<8x512xf32>
    %32 = arith.mulf %30, %31 : vector<8x512xf32>
    %33 = vector.broadcast %2 : vector<1x512xf32> to vector<8x512xf32>
    %34 = arith.addf %32, %33 : vector<8x512xf32>
    %cst_11 = arith.constant 0.000000e+00 : f32
    %35 = vector.broadcast %cst_11 : f32 to vector<8x512xf32>
    %36 = arith.maximumf %34, %35 : vector<8x512xf32>
    %37 = arith.truncf %36 : vector<8x512xf32> to vector<8x512xbf16>
    %c0_12 = arith.constant 0 : index
    %c0_13 = arith.constant 0 : index
    %38 = vector.load %arg2[%c0_12, %c0_13] : memref<512x256xbf16, #tpu.memory_space<vmem>>, vector<512x256xbf16>
    %cst_14 = arith.constant dense<0.000000e+00> : vector<8x256xf32>
    %39 = tpu.matmul %37, %38, %cst_14 {dimension_numbers = #tpu.dot_dimension_numbers<[1], [0], [0], [1], [0, 0, 1, 1], [], []>} : vector<8x512xbf16>, vector<512x256xbf16>, vector<8x256xf32> -> vector<8x256xf32>
    %cst_15 = arith.constant dense<0.000000e+00> : vector<256xf32>
    %40 = vector.multi_reduction <add>, %39, %cst_15 [0] : vector<8x256xf32> to vector<256xf32>
    %41 = vector.shape_cast %40 : vector<256xf32> to vector<1x256xf32>
    %cst_16 = arith.constant 1.250000e-01 : f32
    %42 = vector.broadcast %cst_16 : f32 to vector<1x256xf32>
    %43 = arith.mulf %41, %42 : vector<1x256xf32>
    %44 = arith.mulf %39, %39 : vector<8x256xf32>
    %cst_17 = arith.constant dense<0.000000e+00> : vector<256xf32>
    %45 = vector.multi_reduction <add>, %44, %cst_17 [0] : vector<8x256xf32> to vector<256xf32>
    %46 = vector.shape_cast %45 : vector<256xf32> to vector<1x256xf32>
    %cst_18 = arith.constant 1.250000e-01 : f32
    %47 = vector.broadcast %cst_18 : f32 to vector<1x256xf32>
    %48 = arith.mulf %46, %47 : vector<1x256xf32>
    %49 = arith.mulf %43, %43 : vector<1x256xf32>
    %50 = arith.subf %48, %49 : vector<1x256xf32>
    %cst_19 = arith.constant 0.000000e+00 : f32
    %51 = vector.broadcast %cst_19 : f32 to vector<1x256xf32>
    %52 = arith.maximumf %50, %51 : vector<1x256xf32>
    %53 = vector.broadcast %43 : vector<1x256xf32> to vector<8x256xf32>
    %54 = arith.subf %39, %53 : vector<8x256xf32>
    %cst_20 = arith.constant 9.99999974E-6 : f32
    %55 = vector.broadcast %cst_20 : f32 to vector<1x256xf32>
    %56 = arith.addf %52, %55 : vector<1x256xf32>
    %57 = math.rsqrt %56 : vector<1x256xf32>
    %58 = vector.broadcast %57 : vector<1x256xf32> to vector<8x256xf32>
    %59 = arith.mulf %54, %58 : vector<8x256xf32>
    %60 = vector.broadcast %3 : vector<1x256xf32> to vector<8x256xf32>
    %61 = arith.mulf %59, %60 : vector<8x256xf32>
    %62 = vector.broadcast %4 : vector<1x256xf32> to vector<8x256xf32>
    %63 = arith.addf %61, %62 : vector<8x256xf32>
    %cst_21 = arith.constant 0.000000e+00 : f32
    %64 = vector.broadcast %cst_21 : f32 to vector<8x256xf32>
    %65 = arith.maximumf %63, %64 : vector<8x256xf32>
    %66 = arith.truncf %65 : vector<8x256xf32> to vector<8x256xbf16>
    %c0_22 = arith.constant 0 : index
    %c0_23 = arith.constant 0 : index
    %67 = vector.load %arg3[%c0_22, %c0_23] : memref<256x128xbf16, #tpu.memory_space<vmem>>, vector<256x128xbf16>
    %cst_24 = arith.constant dense<0.000000e+00> : vector<8x128xf32>
    %68 = tpu.matmul %66, %67, %cst_24 {dimension_numbers = #tpu.dot_dimension_numbers<[1], [0], [0], [1], [0, 0, 1, 1], [], []>} : vector<8x256xbf16>, vector<256x128xbf16>, vector<8x128xf32> -> vector<8x128xf32>
    %cst_25 = arith.constant dense<0.000000e+00> : vector<128xf32>
    %69 = vector.multi_reduction <add>, %68, %cst_25 [0] : vector<8x128xf32> to vector<128xf32>
    %70 = vector.shape_cast %69 : vector<128xf32> to vector<1x128xf32>
    %cst_26 = arith.constant 1.250000e-01 : f32
    %71 = vector.broadcast %cst_26 : f32 to vector<1x128xf32>
    %72 = arith.mulf %70, %71 : vector<1x128xf32>
    %73 = arith.mulf %68, %68 : vector<8x128xf32>
    %cst_27 = arith.constant dense<0.000000e+00> : vector<128xf32>
    %74 = vector.multi_reduction <add>, %73, %cst_27 [0] : vector<8x128xf32> to vector<128xf32>
    %75 = vector.shape_cast %74 : vector<128xf32> to vector<1x128xf32>
    %cst_28 = arith.constant 1.250000e-01 : f32
    %76 = vector.broadcast %cst_28 : f32 to vector<1x128xf32>
    %77 = arith.mulf %75, %76 : vector<1x128xf32>
    %78 = arith.mulf %72, %72 : vector<1x128xf32>
    %79 = arith.subf %77, %78 : vector<1x128xf32>
    %cst_29 = arith.constant 0.000000e+00 : f32
    %80 = vector.broadcast %cst_29 : f32 to vector<1x128xf32>
    %81 = arith.maximumf %79, %80 : vector<1x128xf32>
    %82 = vector.broadcast %72 : vector<1x128xf32> to vector<8x128xf32>
    %83 = arith.subf %68, %82 : vector<8x128xf32>
    %cst_30 = arith.constant 9.99999974E-6 : f32
    %84 = vector.broadcast %cst_30 : f32 to vector<1x128xf32>
    %85 = arith.addf %81, %84 : vector<1x128xf32>
    %86 = math.rsqrt %85 : vector<1x128xf32>
    %87 = vector.broadcast %86 : vector<1x128xf32> to vector<8x128xf32>
    %88 = arith.mulf %83, %87 : vector<8x128xf32>
    %89 = vector.broadcast %5 : vector<1x128xf32> to vector<8x128xf32>
    %90 = arith.mulf %88, %89 : vector<8x128xf32>
    %91 = vector.broadcast %6 : vector<1x128xf32> to vector<8x128xf32>
    %92 = arith.addf %90, %91 : vector<8x128xf32>
    %cst_31 = arith.constant 0.000000e+00 : f32
    %93 = vector.broadcast %cst_31 : f32 to vector<8x128xf32>
    %94 = arith.maximumf %92, %93 : vector<8x128xf32>
    %95 = arith.truncf %94 : vector<8x128xf32> to vector<8x128xbf16>
    %c0_32 = arith.constant 0 : index
    %c0_33 = arith.constant 0 : index
    %96 = vector.load %arg4[%c0_32, %c0_33] : memref<128x128xbf16, #tpu.memory_space<vmem>>, vector<128x128xbf16>
    %cst_34 = arith.constant dense<0.000000e+00> : vector<8x128xf32>
    %97 = tpu.matmul %95, %96, %cst_34 {dimension_numbers = #tpu.dot_dimension_numbers<[1], [0], [0], [1], [0, 0, 1, 1], [], []>} : vector<8x128xbf16>, vector<128x128xbf16>, vector<8x128xf32> -> vector<8x128xf32>
    %98 = vector.broadcast %7 : vector<1x128xf32> to vector<8x128xf32>
    %99 = arith.addf %97, %98 : vector<8x128xf32>
    %c0_35 = arith.constant 0 : index
    %c0_36 = arith.constant 0 : index
    %100 = vector.load %arg6[%c0_35, %c0_36] : memref<8x128xf32, #tpu.memory_space<vmem>>, vector<8x128xf32>
    tpu.vector_store %arg6[%c0_35, %c0_36], %99 {strides = array<i32>} : memref<8x128xf32, #tpu.memory_space<vmem>>, vector<8x128xf32>,
    return
  }
}

</mosaic_0001>

<bundles_post_ra>
// kernel: neural_network_forward.1
= control target key start
LH: loop header
LB: loop body
LE: loop exit
PB: predicated region body
PF: predicated region fallthrough
CT: control target
= control target key end

     0   :  { %11 = vsyncpa [#allocation3], 0  ;;  %s3950_s0 = inlined_call_operand.vmem [shape: bf16[8,784], index: 0, kind: input, shape index: {}]   ;;  %s3951_s1 = inlined_call_operand.hbm [shape: bf16[784,512], index: 1, kind: input, shape index: {}]   ;;  %s3952_s2 = inlined_call_operand.vmem [shape: bf16[512,256], index: 2, kind: input, shape index: {}]   ;;  %s3953_s3 = inlined_call_operand.hbm [shape: bf16[256,128], index: 3, kind: input, shape index: {}]   ;;  %s3954_s4 = inlined_call_operand.hbm [shape: bf16[128,128], index: 4, kind: input, shape index: {}]   ;;  %s3955_s5 = inlined_call_operand.hbm [shape: f32[8,512], index: 5, kind: input, shape index: {}]   ;;  %s3956_s6 = inlined_call_operand.hbm [shape: f32[8,128], index: 6, kind: output, shape index: {}]  }
   0x1   :  { %12 = vsyncpa [#allocation6], 0 }
   0x2   :  { %13 = vsyncpa [#allocation9], 0 }
   0x3   :  { %14 = vsyncpa [#allocation4], 0  ;;  %s3552_s21 = smov [#allocation5]   ;;  %s3434_s25 = scalar_lea.hbm %s3953_s3, 2048 }
   0x4   :  { %s36_s22 = sshll.u32 %s3552_s21, 4  ;;  %p3435_p0 = scmp.ne.s32.totalorder %s3953_s3, %s3434_s25  ;;  %s37_s22 = int_to_ptr.vmem [resolvable:$true] %s36_s22 }
   0x5   :  { %p3438_p1 = scmp.lt.u32.totalorder %s3434_s25, %s3953_s3 }
   0x7   :  { %p3440_p2 = pnand %p3438_p1, %p3435_p0 }
   0x9   :  { %3443 = shalt.err (!%p3440_p2)
}
   0xa   :  { %s3444_s30 = scalar_lea.vmem %s37_s22, 2048  ;;  %p3449_p4 = scmp.lt.s32.totalorder %s37_s22, %s37_s22 }
   0xb   :  { %p3445_p3 = scmp.ne.s32.totalorder %s37_s22, %s3444_s30  ;;  %p3450_p5 = scmp.lt.s32.totalorder %s3444_s30, %s3444_s30 }
   0xd   :  { %p3451_p6 = por %p3450_p5, %p3449_p4 }
   0xf   :  { %p3452_p7 = pnand %p3451_p6, %p3445_p3 }
  0x11   :  { %3455 = shalt.err (!%p3452_p7)
}
  0x12   :  { %s3553_s7 = smov 64   ;;  %s3554_s8 = smov 4  }
  0x13   :  { %42 = dma.hbm_to_vmem [thread:$0]  %s3953_s3, 2048, %s37_s22, [#allocation6], %s3553_s7, %s3553_s7, %s3554_s8  }
  0x14   :  { %s3555_s11 = smov [#allocation2]   ;;  %s3456_s15 = scalar_lea.hbm %s3951_s1, 25088 }
  0x15   :  { %s22_s12 = sshll.u32 %s3555_s11, 4  ;;  %p3457_p8 = scmp.ne.s32.totalorder %s3951_s1, %s3456_s15  ;;  %s23_s12 = int_to_ptr.vmem [resolvable:$true] %s22_s12 }
  0x16   :  { %p3460_p9 = scmp.lt.u32.totalorder %s3456_s15, %s3951_s1 }
  0x18   :  { %p3462_p10 = pnand %p3460_p9, %p3457_p8 }
  0x1a   :  { %3465 = shalt.err (!%p3462_p10)
}
  0x1b   :  { %s3466_s20 = scalar_lea.vmem %s23_s12, 25088  ;;  %p3471_p12 = scmp.lt.s32.totalorder %s23_s12, %s23_s12 }
  0x1c   :  { %p3467_p11 = scmp.ne.s32.totalorder %s23_s12, %s3466_s20  ;;  %p3472_p13 = scmp.lt.s32.totalorder %s3466_s20, %s3466_s20 }
  0x1e   :  { %p3473_p0 = por %p3472_p13, %p3471_p12 }
  0x20   :  { %p3474_p1 = pnand %p3473_p0, %p3467_p11 }
  0x22   :  { %3477 = shalt.err (!%p3474_p1)
}
  0x23   :  { %s3556_s3 = smov 256   ;;  %s3557_s21 = smov 16  }
  0x24   :  { %28 = dma.hbm_to_vmem [thread:$0]  %s3951_s1, 25088, %s23_s12, [#allocation3], %s3556_s3, %s3556_s3, %s3557_s21  }
  0x25   :  { %s3558_s24 = smov [#allocation7]   ;;  %s3559_s26 = smov [#allocation8]  }
  0x26   :  { %s48_s25 = sshll.u32 %s3558_s24, 4  ;;  %s61_s27 = sshll.u32 %s3559_s26, 4  ;;  %s49_s25 = int_to_ptr.vmem [resolvable:$true] %s48_s25  ;;  %s62_s27 = int_to_ptr.vmem [resolvable:$true] %s61_s27 }
  0x27   :  { %s3478_s30 = scalar_lea.hbm %s3954_s4, 1024 }
  0x28   :  { %p3479_p2 = scmp.ne.s32.totalorder %s3954_s4, %s3478_s30  ;;  %p3482_p3 = scmp.lt.u32.totalorder %s3478_s30, %s3954_s4 }
  0x2a   :  { %p3484_p4 = pnand %p3482_p3, %p3479_p2 }
  0x2c   :  { %3487 = shalt.err (!%p3484_p4)
}
  0x2d   :  { %s3488_s1 = scalar_lea.vmem %s49_s25, 1024  ;;  %p3493_p6 = scmp.lt.s32.totalorder %s49_s25, %s49_s25 }
  0x2e   :  { %p3489_p5 = scmp.ne.s32.totalorder %s49_s25, %s3488_s1  ;;  %p3494_p7 = scmp.lt.s32.totalorder %s3488_s1, %s3488_s1 }
  0x30   :  { %p3495_p8 = por %p3494_p7, %p3493_p6 }
  0x32   :  { %p3496_p9 = pnand %p3495_p8, %p3489_p5 }
  0x34   :  { %3499 = shalt.err (!%p3496_p9)
}
  0x35   :  { %54 = dma.hbm_to_vmem [thread:$0]  %s3954_s4, 1024, %s49_s25, [#allocation6], %s3553_s7, %s3553_s7, %s3554_s8  }
  0x36   :  { %s3500_s17 = scalar_lea.hbm %s3955_s5, 512 }
  0x37   :  { %p3501_p10 = scmp.ne.s32.totalorder %s3955_s5, %s3500_s17  ;;  %p3504_p11 = scmp.lt.u32.totalorder %s3500_s17, %s3955_s5 }
  0x39   :  { %p3506_p12 = pnand %p3504_p11, %p3501_p10 }
  0x3b   :  { %3509 = shalt.err (!%p3506_p12)
}
  0x3c   :  { %s3510_s21 = scalar_lea.vmem %s62_s27, 512  ;;  %p3515_p0 = scmp.lt.s32.totalorder %s62_s27, %s62_s27 }
  0x3d   :  { %p3511_p13 = scmp.ne.s32.totalorder %s62_s27, %s3510_s21  ;;  %p3516_p1 = scmp.lt.s32.totalorder %s3510_s21, %s3510_s21 }
  0x3f   :  { %p3517_p2 = por %p3516_p1, %p3515_p0 }
  0x41   :  { %p3518_p3 = pnand %p3517_p2, %p3511_p13 }
  0x43   :  { %3521 = shalt.err (!%p3518_p3)
}
  0x44   :  { %64 = dma.hbm_to_vmem [thread:$0]  %s3955_s5, 512, %s62_s27, [#allocation9]  }
  0x45   :  { %3544 = dma.done.wait [#allocation3], 25088  }
  0x46   :  { %3545 = vsyncadd [#allocation3], 4294942208 }
  0x47   :  { %3546 = dma.done.wait [#allocation6], 3072  }
  0x48   :  { %3547 = vsyncadd [#allocation6], 4294964224 }
  0x49   :  { %3548 = dma.done.wait [#allocation9], 512  }
  0x4a   :  { %3549 = vsyncadd [#allocation9], 4294966784  ;;  %v3560_v0 = vmov 0   ;;  %v2998_v1 = vld [vmem:[#allocation2 + $0x4] ss:$16 sps:$4 sm:$0xff]   ;;  %vm1286_vm0 = vcmask 130048  }
  0x4b   :  { %1445 = vmatprep.mubr.bf16.mxu1 %v3560_v0  ;;  %v3000_v2 = vld [vmem:[#allocation2 + $0x604] ss:$16 sps:$4 sm:$0xff]   ;;  %1290 = vmatprep.subr.bf16.mxu0 %v2998_v1  ;;  %v3002_v3 = vld [vmem:[#allocation2] ss:$16 sps:$4 sm:$0xff]   ;;  %v3006_v6 = vld [vmem:[#allocation2 + $0x8] ss:$16 sps:$4 sm:$0xff]  }
  0x4c   :  { %v3003_v4 = vld [vmem:[#allocation2 + $0x600] ss:$16 sps:$4 sm:$0xff]   ;;  %1413 = vmatprep.subr.bf16.mxu1 %v3000_v2  ;;  %v3004_v5 = vld [vmem:[#allocation2 + $0x24] ss:$16 sps:$4 sm:$0xff]   ;;  %1291 = vmatpush1.bf16.msra.mxu0 %v3002_v3  ;;  %v3008_v7 = vld [vmem:[#allocation2 + $0xc] ss:$16 sps:$4 sm:$0xff]  }
  0x4d   :  { %1414 = vmatpush1.bf16.msra.mxu1 %v3003_v4  ;;  %1292 = vmatprep.subr.bf16.mxu0 %v3004_v5  ;;  %v3009_v8 = vld [vmem:[#allocation2 + $0x20] ss:$16 sps:$4 sm:$0xff]   ;;  %v3010_v9 = vld [vmem:[%s3950_s0 + $0x18] ss:$0 sps:$4 sm:$0xff]   ;;  %v3011_v10 = vld [vmem:[#allocation2 + $0x44] ss:$16 sps:$4 sm:$0xff]  }
  0x4e   :  { %1454 = vmatprep.subr.bf16.mxu1 %v3008_v7  ;;  %v3013_v11 = vld [vmem:[#allocation2 + $0x28] ss:$16 sps:$4 sm:$0xff]   ;;  %v3015_v12 = vld [vmem:[#allocation2 + $0x2c] ss:$16 sps:$4 sm:$0xff]   ;;  %v3016_v13 = vld [vmem:[#allocation2 + $0x40] ss:$16 sps:$4 sm:$0xff]  }
  0x4f   :  { %v3017_v14 = vld [vmem:[#allocation2 + $0x64] ss:$16 sps:$4 sm:$0xff]   ;;  %v3021_v15 = vld [vmem:[#allocation2 + $0x4c] ss:$16 sps:$4 sm:$0xff]   ;;  %v3019_v16 = vld [vmem:[#allocation2 + $0x48] ss:$16 sps:$4 sm:$0xff]  }
  0x50   :  { %2819 = vmatmul.mubr.msk.bf16.vlgmr.msra.gmra.mrb[0].mxu1 %vm1286_vm0, %v3010_v9  ;;  %1293 = vmatpush1.bf16.msra.mxu0 %v3009_v8  ;;  %v3022_v17 = vld [vmem:[#allocation2 + $0x60] ss:$16 sps:$4 sm:$0xff]   ;;  %v3023_v18 = vld [vmem:[#allocation2 + $0x84] ss:$16 sps:$4 sm:$0xff]   ;;  %v3027_v19 = vld [vmem:[#allocation2 + $0x6c] ss:$16 sps:$4 sm:$0xff]  }
  0x51   :  { %1455 = vmatpush1.bf16.msra.mxu1 %v3006_v6  ;;  %1294 = vmatprep.subr.bf16.mxu0 %v3011_v10  ;;  %v3025_v20 = vld [vmem:[#allocation2 + $0x68] ss:$16 sps:$4 sm:$0xff]   ;;  %v3028_v21 = vld [vmem:[#allocation2 + $0x80] ss:$16 sps:$4 sm:$0xff]   ;;  %v3029_v22 = vld [vmem:[#allocation2 + $0xa4] ss:$16 sps:$4 sm:$0xff]  }
  0x52   :  { %1456 = vmatprep.subr.bf16.mxu1 %v3015_v12  ;;  %v3033_v23 = vld [vmem:[#allocation2 + $0x8c] ss:$16 sps:$4 sm:$0xff]   ;;  %v3031_v24 = vld [vmem:[#allocation2 + $0x88] ss:$16 sps:$4 sm:$0xff]   ;;  %v3034_v25 = vld [vmem:[#allocation2 + $0xa0] ss:$16 sps:$4 sm:$0xff]  }
  0x53   :  { %v3035_v26 = vld [vmem:[#allocation2 + $0xc4] ss:$16 sps:$4 sm:$0xff]   ;;  %v3039_v27 = vld [vmem:[#allocation2 + $0xac] ss:$16 sps:$4 sm:$0xff]   ;;  %v3037_v28 = vld [vmem:[#allocation2 + $0xa8] ss:$16 sps:$4 sm:$0xff]  }
  0x54   :  { %1295 = vmatpush1.bf16.msra.mxu0 %v3016_v13  ;;  %v3040_v29 = vld [vmem:[#allocation2 + $0xc0] ss:$16 sps:$4 sm:$0xff]   ;;  %v3041_v30 = vld [vmem:[#allocation2 + $0xe4] ss:$16 sps:$4 sm:$0xff]   ;;  %v3045_v31 = vld [vmem:[#allocation2 + $0xcc] ss:$16 sps:$4 sm:$0xff]  }
  0x55   :  { %1457 = vmatpush1.bf16.msra.mxu1 %v3013_v11  ;;  %1296 = vmatprep.subr.bf16.mxu0 %v3017_v14  ;;  %v3043_v32 = vld [vmem:[#allocation2 + $0xc8] ss:$16 sps:$4 sm:$0xff]   ;;  %v3046_v33 = vld [vmem:[#allocation2 + $0xe0] ss:$16 sps:$4 sm:$0xff]   ;;  %v3047_v34 = vld [vmem:[#allocation2 + $0x104] ss:$16 sps:$4 sm:$0xff]  }
  0x56   :  { %1458 = vmatprep.subr.bf16.mxu1 %v3021_v15  ;;  %v3051_v35 = vld [vmem:[#allocation2 + $0xec] ss:$16 sps:$4 sm:$0xff]   ;;  %v3049_v36 = vld [vmem:[#allocation2 + $0xe8] ss:$16 sps:$4 sm:$0xff]   ;;  %v3052_v37 = vld [vmem:[#allocation2 + $0x100] ss:$16 sps:$4 sm:$0xff]  }
  0x57   :  { %v3053_v38 = vld [vmem:[#allocation2 + $0x124] ss:$16 sps:$4 sm:$0xff]   ;;  %v3057_v39 = vld [vmem:[#allocation2 + $0x10c] ss:$16 sps:$4 sm:$0xff]   ;;  %v3055_v40 = vld [vmem:[#allocation2 + $0x108] ss:$16 sps:$4 sm:$0xff]  }
  0x58   :  { %1297 = vmatpush1.bf16.msra.mxu0 %v3022_v17  ;;  %v3058_v41 = vld [vmem:[#allocation2 + $0x120] ss:$16 sps:$4 sm:$0xff]   ;;  %v3059_v42 = vld [vmem:[#allocation2 + $0x144] ss:$16 sps:$4 sm:$0xff]   ;;  %v3063_v43 = vld [vmem:[#allocation2 + $0x12c] ss:$16 sps:$4 sm:$0xff]  }
  0x59   :  { %1459 = vmatpush1.bf16.msra.mxu1 %v3019_v16  ;;  %1298 = vmatprep.subr.bf16.mxu0 %v3023_v18  ;;  %v3061_v44 = vld [vmem:[#allocation2 + $0x128] ss:$16 sps:$4 sm:$0xff]   ;;  %v3064_v45 = vld [vmem:[#allocation2 + $0x140] ss:$16 sps:$4 sm:$0xff]   ;;  %v3065_v46 = vld [vmem:[#allocation2 + $0x164] ss:$16 sps:$4 sm:$0xff]  }
  0x5a   :  { %1460 = vmatprep.subr.bf16.mxu1 %v3027_v19  ;;  %v3069_v47 = vld [vmem:[#allocation2 + $0x14c] ss:$16 sps:$4 sm:$0xff]   ;;  %v3067_v48 = vld [vmem:[#allocation2 + $0x148] ss:$16 sps:$4 sm:$0xff]   ;;  %v82_v49 = vld [vmem:[%s3950_s0] sm:$0xff]  ;;  %vm3562_vm1 = vmmov 0  }
  0x5b   :  { %v3070_v50 = vld [vmem:[#allocation2 + $0x160] ss:$16 sps:$4 sm:$0xff]   ;;  %v3071_v51 = vld [vmem:[#allocation2 + $0x184] ss:$16 sps:$4 sm:$0xff]   ;;  %v2617_v52 = vcombine.high %v82_v49, %v82_v49  ;;  %v3075_v53 = vld [vmem:[#allocation2 + $0x16c] ss:$16 sps:$4 sm:$0xff]   ;;  %v2616_v7 = vcombine.low %v82_v49, %v82_v49 }
  0x5c   :  { %1299 = vmatpush1.bf16.msra.mxu0 %v3028_v21  ;;  %v3073_v54 = vld [vmem:[#allocation2 + $0x168] ss:$16 sps:$4 sm:$0xff]   ;;  %v3076_v55 = vld [vmem:[#allocation2 + $0x180] ss:$16 sps:$4 sm:$0xff]   ;;  %v3077_v56 = vld [vmem:[#allocation2 + $0x1a4] ss:$16 sps:$4 sm:$0xff]  }
  0x5d   :  { %1461 = vmatpush1.bf16.msra.mxu1 %v3025_v20  ;;  %1300 = vmatprep.subr.bf16.mxu0 %v3029_v22  ;;  %v3081_v57 = vld [vmem:[#allocation2 + $0x18c] ss:$16 sps:$4 sm:$0xff]   ;;  %v3079_v58 = vld [vmem:[#allocation2 + $0x188] ss:$16 sps:$4 sm:$0xff]   ;;  %v3082_v59 = vld [vmem:[#allocation2 + $0x1a0] ss:$16 sps:$4 sm:$0xff]  }
  0x5e   :  { %1462 = vmatprep.subr.bf16.mxu1 %v3033_v23  ;;  %1322 = vmatprep.mubr.bf16.mxu0 %v2617_v52  ;;  %v3083_v60 = vld [vmem:[#allocation2 + $0x1c4] ss:$16 sps:$4 sm:$0xff]   ;;  %v3087_v61 = vld [vmem:[#allocation2 + $0x1ac] ss:$16 sps:$4 sm:$0xff]   ;;  %v3085_v62 = vld [vmem:[#allocation2 + $0x1a8] ss:$16 sps:$4 sm:$0xff]  }
  0x5f   :  { %1486 = vmatprep.mubr.bf16.mxu1 %v2617_v52  ;;  %v3088_v63 = vld [vmem:[#allocation2 + $0x1c0] ss:$16 sps:$4 sm:$0xff]   ;;  %v3089_v1 = vld [vmem:[#allocation2 + $0x1e4] ss:$16 sps:$4 sm:$0xff]   ;;  %v3093_v2 = vld [vmem:[#allocation2 + $0x1cc] ss:$16 sps:$4 sm:$0xff]  }
  0x60   :  { %1301 = vmatpush1.bf16.msra.mxu0 %v3034_v25  ;;  %v3091_v3 = vld [vmem:[#allocation2 + $0x1c8] ss:$16 sps:$4 sm:$0xff]   ;;  %v3094_v4 = vld [vmem:[#allocation2 + $0x1e0] ss:$16 sps:$4 sm:$0xff]   ;;  %v3099_v5 = vld [vmem:[#allocation2 + $0x204] ss:$16 sps:$4 sm:$0xff]  }
  0x61   :  { %1463 = vmatpush1.bf16.msra.mxu1 %v3031_v24  ;;  %1302 = vmatprep.subr.bf16.mxu0 %v3035_v26  ;;  %v3102_v6 = vld [vmem:[#allocation2 + $0x1ec] ss:$16 sps:$4 sm:$0xff]   ;;  %v3097_v8 = vld [vmem:[#allocation2 + $0x200] ss:$16 sps:$4 sm:$0xff]   ;;  %v3100_v9 = vld [vmem:[#allocation2 + $0x1e8] ss:$16 sps:$4 sm:$0xff]  }
  0x62   :  { %1464 = vmatprep.subr.bf16.mxu1 %v3039_v27  ;;  %v3105_v10 = vld [vmem:[#allocation2 + $0x224] ss:$16 sps:$4 sm:$0xff]   ;;  %v3108_v11 = vld [vmem:[#allocation2 + $0x20c] ss:$16 sps:$4 sm:$0xff]   ;;  %v3103_v12 = vld [vmem:[#allocation2 + $0x220] ss:$16 sps:$4 sm:$0xff]  }
  0x63   :  { %v3106_v13 = vld [vmem:[#allocation2 + $0x208] ss:$16 sps:$4 sm:$0xff]   ;;  %v3111_v14 = vld [vmem:[#allocation2 + $0x244] ss:$16 sps:$4 sm:$0xff]   ;;  %v3114_v15 = vld [vmem:[#allocation2 + $0x22c] ss:$16 sps:$4 sm:$0xff]  }
  0x64   :  { %1303 = vmatpush1.bf16.msra.mxu0 %v3040_v29  ;;  %v3109_v16 = vld [vmem:[#allocation2 + $0x240] ss:$16 sps:$4 sm:$0xff]   ;;  %v3112_v17 = vld [vmem:[#allocation2 + $0x228] ss:$16 sps:$4 sm:$0xff]   ;;  %v3117_v18 = vld [vmem:[#allocation2 + $0x264] ss:$16 sps:$4 sm:$0xff]  }
  0x65   :  { %1465 = vmatpush1.bf16.msra.mxu1 %v3037_v28  ;;  %1304 = vmatprep.subr.bf16.mxu0 %v3041_v30  ;;  %v3120_v19 = vld [vmem:[#allocation2 + $0x24c] ss:$16 sps:$4 sm:$0xff]   ;;  %v3115_v20 = vld [vmem:[#allocation2 + $0x260] ss:$16 sps:$4 sm:$0xff]   ;;  %v3118_v21 = vld [vmem:[#allocation2 + $0x248] ss:$16 sps:$4 sm:$0xff]  }
  0x66   :  { %1466 = vmatprep.subr.bf16.mxu1 %v3045_v31  ;;  %v3123_v22 = vld [vmem:[#allocation2 + $0x284] ss:$16 sps:$4 sm:$0xff]   ;;  %v3126_v23 = vld [vmem:[#allocation2 + $0x26c] ss:$16 sps:$4 sm:$0xff]   ;;  %v3121_v24 = vld [vmem:[#allocation2 + $0x280] ss:$16 sps:$4 sm:$0xff]  }
  0x67   :  { %v3124_v25 = vld [vmem:[#allocation2 + $0x268] ss:$16 sps:$4 sm:$0xff]   ;;  %v3129_v26 = vld [vmem:[#allocation2 + $0x2a4] ss:$16 sps:$4 sm:$0xff]   ;;  %v3132_v27 = vld [vmem:[#allocation2 + $0x28c] ss:$16 sps:$4 sm:$0xff]  }
  0x68   :  { %1305 = vmatpush1.bf16.msra.mxu0 %v3046_v33  ;;  %v3127_v28 = vld [vmem:[#allocation2 + $0x2a0] ss:$16 sps:$4 sm:$0xff]   ;;  %v3130_v29 = vld [vmem:[#allocation2 + $0x288] ss:$16 sps:$4 sm:$0xff]   ;;  %v3135_v30 = vld [vmem:[#allocation2 + $0x2c4] ss:$16 sps:$4 sm:$0xff]  }
  0x69   :  { %1467 = vmatpush1.bf16.msra.mxu1 %v3043_v32  ;;  %1306 = vmatprep.subr.bf16.mxu0 %v3047_v34  ;;  %v3138_v31 = vld [vmem:[#allocation2 + $0x2ac] ss:$16 sps:$4 sm:$0xff]   ;;  %v3133_v33 = vld [vmem:[#allocation2 + $0x2c0] ss:$16 sps:$4 sm:$0xff]   ;;  %v3136_v34 = vld [vmem:[#allocation2 + $0x2a8] ss:$16 sps:$4 sm:$0xff]  }
  0x6a   :  { %1468 = vmatprep.subr.bf16.mxu1 %v3051_v35  ;;  %v3664_v32 = vld [vmem:[%s3950_s0 + $0x8] sm:$0xff]  ;;  %v3165_v52 = vld [vmem:[#allocation2 + $0x364] ss:$16 sps:$4 sm:$0xff]  }
  0x6b   :  { %v2619_v35 = vcombine.high %v3664_v32, %v3664_v32  ;;  %v3162_v49 = vld [vmem:[#allocation2 + $0x32c] ss:$16 sps:$4 sm:$0xff]  }
  0x6c   :  { %1307 = vmatpush1.bf16.msra.mxu0 %v3052_v37  ;;  %v3144_v37 = vld [vmem:[#allocation2 + $0x2cc] ss:$16 sps:$4 sm:$0xff]  }
  0x6d   :  { %1469 = vmatpush1.bf16.msra.mxu1 %v3049_v36  ;;  %1308 = vmatprep.subr.bf16.mxu0 %v3053_v38  ;;  %v3141_v36 = vld [vmem:[#allocation2 + $0x2e4] ss:$16 sps:$4 sm:$0xff]   ;;  %v3139_v38 = vld [vmem:[#allocation2 + $0x2e0] ss:$16 sps:$4 sm:$0xff]  }
  0x6e   :  { %1470 = vmatprep.subr.bf16.mxu1 %v3057_v39  ;;  %v3142_v39 = vld [vmem:[#allocation2 + $0x2c8] ss:$16 sps:$4 sm:$0xff]  }
  0x70   :  { %1309 = vmatpush1.bf16.msra.mxu0 %v3058_v41  ;;  %v3150_v41 = vld [vmem:[#allocation2 + $0x2ec] ss:$16 sps:$4 sm:$0xff]  }
  0x71   :  { %1471 = vmatpush1.bf16.msra.mxu1 %v3055_v40  ;;  %1310 = vmatprep.subr.bf16.mxu0 %v3059_v42  ;;  %v3147_v40 = vld [vmem:[#allocation2 + $0x304] ss:$16 sps:$4 sm:$0xff]   ;;  %v3145_v42 = vld [vmem:[#allocation2 + $0x300] ss:$16 sps:$4 sm:$0xff]  }
  0x72   :  { %1472 = vmatprep.subr.bf16.mxu1 %v3063_v43  ;;  %v3148_v43 = vld [vmem:[#allocation2 + $0x2e8] ss:$16 sps:$4 sm:$0xff]  }
  0x74   :  { %1311 = vmatpush1.bf16.msra.mxu0 %v3064_v45  ;;  %v3156_v45 = vld [vmem:[#allocation2 + $0x30c] ss:$16 sps:$4 sm:$0xff]  }
  0x75   :  { %1473 = vmatpush1.bf16.msra.mxu1 %v3061_v44  ;;  %1312 = vmatprep.subr.bf16.mxu0 %v3065_v46  ;;  %v3153_v44 = vld [vmem:[#allocation2 + $0x324] ss:$16 sps:$4 sm:$0xff]   ;;  %v3151_v46 = vld [vmem:[#allocation2 + $0x320] ss:$16 sps:$4 sm:$0xff]  }
  0x76   :  { %1474 = vmatprep.subr.bf16.mxu1 %v3069_v47  ;;  %v3154_v47 = vld [vmem:[#allocation2 + $0x308] ss:$16 sps:$4 sm:$0xff]  }
  0x78   :  { %1313 = vmatpush1.bf16.msra.mxu0 %v3070_v50  ;;  %v3157_v50 = vld [vmem:[#allocation2 + $0x340] ss:$16 sps:$4 sm:$0xff]  }
  0x79   :  { %1475 = vmatpush1.bf16.msra.mxu1 %v3067_v48  ;;  %1314 = vmatprep.subr.bf16.mxu0 %v3071_v51  ;;  %v3159_v48 = vld [vmem:[#allocation2 + $0x344] ss:$16 sps:$4 sm:$0xff]   ;;  %v3160_v51 = vld [vmem:[#allocation2 + $0x328] ss:$16 sps:$4 sm:$0xff]  }
  0x7a   :  { %1476 = vmatprep.subr.bf16.mxu1 %v3075_v53  ;;  %v3168_v53 = vld [vmem:[#allocation2 + $0x34c] ss:$16 sps:$4 sm:$0xff]  }
  0x7c   :  { %1315 = vmatpush1.bf16.msra.mxu0 %v3076_v55  ;;  %v3166_v55 = vld [vmem:[#allocation2 + $0x348] ss:$16 sps:$4 sm:$0xff]  }
  0x7d   :  { %1477 = vmatpush1.bf16.msra.mxu1 %v3073_v54  ;;  %1316 = vmatprep.subr.bf16.mxu0 %v3077_v56  ;;  %v3163_v54 = vld [vmem:[#allocation2 + $0x360] ss:$16 sps:$4 sm:$0xff]   ;;  %v3171_v56 = vld [vmem:[#allocation2 + $0x384] ss:$16 sps:$4 sm:$0xff]  }
  0x7e   :  { %1478 = vmatprep.subr.bf16.mxu1 %v3081_v57  ;;  %v3174_v57 = vld [vmem:[#allocation2 + $0x36c] ss:$16 sps:$4 sm:$0xff]  }
  0x80   :  { %1317 = vmatpush1.bf16.msra.mxu0 %v3082_v59  ;;  %v3172_v59 = vld [vmem:[#allocation2 + $0x368] ss:$16 sps:$4 sm:$0xff]  }
  0x81   :  { %1479 = vmatpush1.bf16.msra.mxu1 %v3079_v58  ;;  %1318 = vmatprep.subr.bf16.mxu0 %v3083_v60  ;;  %v3169_v58 = vld [vmem:[#allocation2 + $0x380] ss:$16 sps:$4 sm:$0xff]   ;;  %v3177_v60 = vld [vmem:[#allocation2 + $0x3a4] ss:$16 sps:$4 sm:$0xff]  }
  0x82   :  { %1480 = vmatprep.subr.bf16.mxu1 %v3087_v61  ;;  %v3180_v61 = vld [vmem:[#allocation2 + $0x38c] ss:$16 sps:$4 sm:$0xff]  }
  0x84   :  { %1319 = vmatpush1.bf16.msra.mxu0 %v3088_v63  ;;  %v3178_v63 = vld [vmem:[#allocation2 + $0x388] ss:$16 sps:$4 sm:$0xff]  }
  0x85   :  { %1481 = vmatpush1.bf16.msra.mxu1 %v3085_v62  ;;  %1320 = vmatprep.subr.bf16.mxu0 %v3089_v1  ;;  %v3175_v62 = vld [vmem:[#allocation2 + $0x3a0] ss:$16 sps:$4 sm:$0xff]   ;;  %v3183_v1 = vld [vmem:[#allocation2 + $0x3c4] ss:$16 sps:$4 sm:$0xff]  }
  0x86   :  { %1482 = vmatprep.subr.bf16.mxu1 %v3093_v2  ;;  %v3186_v2 = vld [vmem:[#allocation2 + $0x3ac] ss:$16 sps:$4 sm:$0xff]  }
  0x88   :  { %1321 = vmatpush1.bf16.msra.mxu0 %v3094_v4  ;;  %v3184_v4 = vld [vmem:[#allocation2 + $0x3a8] ss:$16 sps:$4 sm:$0xff]  }
  0x89   :  { %1483 = vmatpush1.bf16.msra.mxu1 %v3091_v3  ;;  %1331 = vmatprep.subr.bf16.mxu0 %v3099_v5  ;;  %v3181_v3 = vld [vmem:[#allocation2 + $0x3c0] ss:$16 sps:$4 sm:$0xff]   ;;  %v3189_v5 = vld [vmem:[#allocation2 + $0x3e4] ss:$16 sps:$4 sm:$0xff]  }
  0x8a   :  { %1484 = vmatprep.subr.bf16.mxu1 %v3102_v6  ;;  %v3192_v6 = vld [vmem:[#allocation2 + $0x3cc] ss:$16 sps:$4 sm:$0xff]  }
  0x8b   :  { %1323 = vmatmul.mubr.bf16.vlgmr.msra.gmra.mrb[0].mxu0 %v2616_v7 }
  0x8c   :  { %1332 = vmatpush1.bf16.msra.mxu0 %v3097_v8  ;;  %1363 = vmatprep.mubr.bf16.mxu0 %v2619_v35  ;;  %v3190_v8 = vld [vmem:[#allocation2 + $0x3c8] ss:$16 sps:$4 sm:$0xff]  }
  0x8d   :  { %1485 = vmatpush1.bf16.msra.mxu1 %v3100_v9  ;;  %1333 = vmatprep.subr.bf16.mxu0 %v3105_v10  ;;  %v3197_v9 = vld [vmem:[#allocation2 + $0x404] ss:$16 sps:$4 sm:$0xff]   ;;  %v3200_v10 = vld [vmem:[#allocation2 + $0x3ec] ss:$16 sps:$4 sm:$0xff]  }
  0x8e   :  { %1495 = vmatprep.subr.bf16.mxu1 %v3108_v11  ;;  %v2618_v11 = vcombine.low %v3664_v32, %v3664_v32  ;;  %v3227_v32 = vld [vmem:[#allocation2 + $0x4a4] ss:$16 sps:$4 sm:$0xff]  }
  0x90   :  { %1487 = vmatmul.mubr.bf16.vlgmr.msra.gmra.mrb[4].mxu1 %v2616_v7  ;;  %1334 = vmatpush1.bf16.msra.mxu0 %v3103_v12  ;;  %v3187_v7 = vld [vmem:[#allocation2 + $0x3e0] ss:$16 sps:$4 sm:$0xff]  }
  0x91   :  { %1496 = vmatpush1.bf16.msra.mxu1 %v3106_v13  ;;  %1335 = vmatprep.subr.bf16.mxu0 %v3111_v14  ;;  %v3195_v12 = vld [vmem:[#allocation2 + $0x400] ss:$16 sps:$4 sm:$0xff]   ;;  %v3198_v13 = vld [vmem:[#allocation2 + $0x3e8] ss:$16 sps:$4 sm:$0xff]   ;;  %v3203_v14 = vld [vmem:[#allocation2 + $0x424] ss:$16 sps:$4 sm:$0xff]  }
  0x92   :  { %1497 = vmatprep.subr.bf16.mxu1 %v3114_v15  ;;  %1527 = vmatprep.mubr.bf16.mxu1 %v2619_v35  ;;  %v3206_v15 = vld [vmem:[#allocation2 + $0x40c] ss:$16 sps:$4 sm:$0xff]   ;;  %v3228_v35 = vld [vmem:[#allocation2 + $0x488] ss:$16 sps:$4 sm:$0xff]  }
  0x94   :  { %1336 = vmatpush1.bf16.msra.mxu0 %v3109_v16  ;;  %v3673_v16 = vld [vmem:[%s3950_s0 + $0x10] sm:$0xff] }
  0x95   :  { %1498 = vmatpush1.bf16.msra.mxu1 %v3112_v17  ;;  %1337 = vmatprep.subr.bf16.mxu0 %v3117_v18  ;;  %v2621_v17 = vcombine.high %v3673_v16, %v3673_v16  ;;  %v3201_v18 = vld [vmem:[#allocation2 + $0x420] ss:$16 sps:$4 sm:$0xff]  }
  0x96   :  { %1499 = vmatprep.subr.bf16.mxu1 %v3120_v19  ;;  %v3204_v19 = vld [vmem:[#allocation2 + $0x408] ss:$16 sps:$4 sm:$0xff]  }
  0x98   :  { %1338 = vmatpush1.bf16.msra.mxu0 %v3115_v20  ;;  %v3209_v20 = vld [vmem:[#allocation2 + $0x444] ss:$16 sps:$4 sm:$0xff]  }
  0x99   :  { %1500 = vmatpush1.bf16.msra.mxu1 %v3118_v21  ;;  %1339 = vmatprep.subr.bf16.mxu0 %v3123_v22  ;;  %v3212_v21 = vld [vmem:[#allocation2 + $0x42c] ss:$16 sps:$4 sm:$0xff]   ;;  %v3207_v22 = vld [vmem:[#allocation2 + $0x440] ss:$16 sps:$4 sm:$0xff]  }
  0x9a   :  { %1501 = vmatprep.subr.bf16.mxu1 %v3126_v23  ;;  %v3210_v23 = vld [vmem:[#allocation2 + $0x428] ss:$16 sps:$4 sm:$0xff]  }
  0x9c   :  { %1340 = vmatpush1.bf16.msra.mxu0 %v3121_v24  ;;  %v3215_v24 = vld [vmem:[#allocation2 + $0x464] ss:$16 sps:$4 sm:$0xff]  }
  0x9d   :  { %1502 = vmatpush1.bf16.msra.mxu1 %v3124_v25  ;;  %1341 = vmatprep.subr.bf16.mxu0 %v3129_v26  ;;  %v3218_v25 = vld [vmem:[#allocation2 + $0x44c] ss:$16 sps:$4 sm:$0xff]   ;;  %v3213_v26 = vld [vmem:[#allocation2 + $0x460] ss:$16 sps:$4 sm:$0xff]  }
  0x9e   :  { %1503 = vmatprep.subr.bf16.mxu1 %v3132_v27  ;;  %v3216_v27 = vld [vmem:[#allocation2 + $0x448] ss:$16 sps:$4 sm:$0xff]  }
  0xa0   :  { %1342 = vmatpush1.bf16.msra.mxu0 %v3127_v28  ;;  %v3221_v28 = vld [vmem:[#allocation2 + $0x484] ss:$16 sps:$4 sm:$0xff]  }
  0xa1   :  { %1504 = vmatpush1.bf16.msra.mxu1 %v3130_v29  ;;  %1343 = vmatprep.subr.bf16.mxu0 %v3135_v30  ;;  %v3224_v29 = vld [vmem:[#allocation2 + $0x46c] ss:$16 sps:$4 sm:$0xff]   ;;  %v3219_v30 = vld [vmem:[#allocation2 + $0x480] ss:$16 sps:$4 sm:$0xff]  }
  0xa2   :  { %1505 = vmatprep.subr.bf16.mxu1 %v3138_v31  ;;  %v3222_v31 = vld [vmem:[#allocation2 + $0x468] ss:$16 sps:$4 sm:$0xff]  }
  0xa4   :  { %1344 = vmatpush1.bf16.msra.mxu0 %v3133_v33  ;;  %v3230_v33 = vld [vmem:[#allocation2 + $0x48c] ss:$16 sps:$4 sm:$0xff]  }
  0xa5   :  { %1506 = vmatpush1.bf16.msra.mxu1 %v3136_v34  ;;  %1345 = vmatprep.subr.bf16.mxu0 %v3141_v36  ;;  %v3225_v34 = vld [vmem:[#allocation2 + $0x4a0] ss:$16 sps:$4 sm:$0xff]   ;;  %v3233_v36 = vld [vmem:[#allocation2 + $0x4c4] ss:$16 sps:$4 sm:$0xff]  }
  0xa6   :  { %1507 = vmatprep.subr.bf16.mxu1 %v3144_v37  ;;  %v3236_v37 = vld [vmem:[#allocation2 + $0x4ac] ss:$16 sps:$4 sm:$0xff]  }
  0xa8   :  { %1346 = vmatpush1.bf16.msra.mxu0 %v3139_v38  ;;  %v3231_v38 = vld [vmem:[#allocation2 + $0x4c0] ss:$16 sps:$4 sm:$0xff]  }
  0xa9   :  { %1508 = vmatpush1.bf16.msra.mxu1 %v3142_v39  ;;  %1347 = vmatprep.subr.bf16.mxu0 %v3147_v40  ;;  %v3234_v39 = vld [vmem:[#allocation2 + $0x4a8] ss:$16 sps:$4 sm:$0xff]   ;;  %v3239_v40 = vld [vmem:[#allocation2 + $0x4e4] ss:$16 sps:$4 sm:$0xff]  }
  0xaa   :  { %1509 = vmatprep.subr.bf16.mxu1 %v3150_v41  ;;  %v3242_v41 = vld [vmem:[#allocation2 + $0x4cc] ss:$16 sps:$4 sm:$0xff]  }
  0xac   :  { %1348 = vmatpush1.bf16.msra.mxu0 %v3145_v42  ;;  %v3237_v42 = vld [vmem:[#allocation2 + $0x4e0] ss:$16 sps:$4 sm:$0xff]  }
  0xad   :  { %1510 = vmatpush1.bf16.msra.mxu1 %v3148_v43  ;;  %1349 = vmatprep.subr.bf16.mxu0 %v3153_v44  ;;  %v3240_v43 = vld [vmem:[#allocation2 + $0x4c8] ss:$16 sps:$4 sm:$0xff]   ;;  %v3245_v44 = vld [vmem:[#allocation2 + $0x504] ss:$16 sps:$4 sm:$0xff]  }
  0xae   :  { %1511 = vmatprep.subr.bf16.mxu1 %v3156_v45  ;;  %v3248_v45 = vld [vmem:[#allocation2 + $0x4ec] ss:$16 sps:$4 sm:$0xff]  }
  0xb0   :  { %1350 = vmatpush1.bf16.msra.mxu0 %v3151_v46  ;;  %v3243_v46 = vld [vmem:[#allocation2 + $0x500] ss:$16 sps:$4 sm:$0xff]  }
  0xb1   :  { %1512 = vmatpush1.bf16.msra.mxu1 %v3154_v47  ;;  %1351 = vmatprep.subr.bf16.mxu0 %v3159_v48  ;;  %v3246_v47 = vld [vmem:[#allocation2 + $0x4e8] ss:$16 sps:$4 sm:$0xff]   ;;  %v3251_v48 = vld [vmem:[#allocation2 + $0x524] ss:$16 sps:$4 sm:$0xff]  }
  0xb2   :  { %1513 = vmatprep.subr.bf16.mxu1 %v3162_v49  ;;  %v3254_v49 = vld [vmem:[#allocation2 + $0x50c] ss:$16 sps:$4 sm:$0xff]  }
  0xb4   :  { %1352 = vmatpush1.bf16.msra.mxu0 %v3157_v50  ;;  %v3249_v50 = vld [vmem:[#allocation2 + $0x520] ss:$16 sps:$4 sm:$0xff]  }
  0xb5   :  { %1514 = vmatpush1.bf16.msra.mxu1 %v3160_v51  ;;  %1353 = vmatprep.subr.bf16.mxu0 %v3165_v52  ;;  %v3252_v51 = vld [vmem:[#allocation2 + $0x508] ss:$16 sps:$4 sm:$0xff]   ;;  %v3257_v52 = vld [vmem:[#allocation2 + $0x544] ss:$16 sps:$4 sm:$0xff]  }
  0xb6   :  { %1515 = vmatprep.subr.bf16.mxu1 %v3168_v53  ;;  %v3260_v53 = vld [vmem:[#allocation2 + $0x52c] ss:$16 sps:$4 sm:$0xff]  }
  0xb8   :  { %1354 = vmatpush1.bf16.msra.mxu0 %v3163_v54  ;;  %v3255_v54 = vld [vmem:[#allocation2 + $0x540] ss:$16 sps:$4 sm:$0xff]  }
  0xb9   :  { %1516 = vmatpush1.bf16.msra.mxu1 %v3166_v55  ;;  %1355 = vmatprep.subr.bf16.mxu0 %v3171_v56  ;;  %v3258_v55 = vld [vmem:[#allocation2 + $0x528] ss:$16 sps:$4 sm:$0xff]   ;;  %v3263_v56 = vld [vmem:[#allocation2 + $0x564] ss:$16 sps:$4 sm:$0xff]  }
  0xba   :  { %1517 = vmatprep.subr.bf16.mxu1 %v3174_v57  ;;  %v3266_v57 = vld [vmem:[#allocation2 + $0x54c] ss:$16 sps:$4 sm:$0xff]  }
  0xbc   :  { %1356 = vmatpush1.bf16.msra.mxu0 %v3169_v58  ;;  %v3261_v58 = vld [vmem:[#allocation2 + $0x560] ss:$16 sps:$4 sm:$0xff]  }
  0xbd   :  { %1518 = vmatpush1.bf16.msra.mxu1 %v3172_v59  ;;  %1357 = vmatprep.subr.bf16.mxu0 %v3177_v60  ;;  %v3264_v59 = vld [vmem:[#allocation2 + $0x548] ss:$16 sps:$4 sm:$0xff]   ;;  %v3269_v60 = vld [vmem:[#allocation2 + $0x584] ss:$16 sps:$4 sm:$0xff]  }
  0xbe   :  { %1519 = vmatprep.subr.bf16.mxu1 %v3180_v61  ;;  %v3272_v61 = vld [vmem:[#allocation2 + $0x56c] ss:$16 sps:$4 sm:$0xff]  }
  0xc0   :  { %1358 = vmatpush1.bf16.msra.mxu0 %v3175_v62  ;;  %v3267_v62 = vld [vmem:[#allocation2 + $0x580] ss:$16 sps:$4 sm:$0xff]  }
  0xc1   :  { %1520 = vmatpush1.bf16.msra.mxu1 %v3178_v63  ;;  %1359 = vmatprep.subr.bf16.mxu0 %v3183_v1  ;;  %v3270_v63 = vld [vmem:[#allocation2 + $0x568] ss:$16 sps:$4 sm:$0xff]   ;;  %v3275_v1 = vld [vmem:[#allocation2 + $0x5a4] ss:$16 sps:$4 sm:$0xff]  }
  0xc2   :  { %1521 = vmatprep.subr.bf16.mxu1 %v3186_v2  ;;  %v3278_v2 = vld [vmem:[#allocation2 + $0x58c] ss:$16 sps:$4 sm:$0xff]  }
  0xc4   :  { %1360 = vmatpush1.bf16.msra.mxu0 %v3181_v3  ;;  %v3273_v3 = vld [vmem:[#allocation2 + $0x5a0] ss:$16 sps:$4 sm:$0xff]  }
  0xc5   :  { %1522 = vmatpush1.bf16.msra.mxu1 %v3184_v4  ;;  %1361 = vmatprep.subr.bf16.mxu0 %v3189_v5  ;;  %v3276_v4 = vld [vmem:[#allocation2 + $0x588] ss:$16 sps:$4 sm:$0xff]   ;;  %v3281_v5 = vld [vmem:[#allocation2 + $0x5c4] ss:$16 sps:$4 sm:$0xff]  }
  0xc6   :  { %1523 = vmatprep.subr.bf16.mxu1 %v3192_v6  ;;  %v3284_v6 = vld [vmem:[#allocation2 + $0x5ac] ss:$16 sps:$4 sm:$0xff]  }
  0xc8   :  { %1362 = vmatpush1.bf16.msra.mxu0 %v3187_v7  ;;  %v3279_v7 = vld [vmem:[#allocation2 + $0x5c0] ss:$16 sps:$4 sm:$0xff]  }
  0xc9   :  { %1524 = vmatpush1.bf16.msra.mxu1 %v3190_v8  ;;  %1372 = vmatprep.subr.bf16.mxu0 %v3197_v9  ;;  %v3282_v8 = vld [vmem:[#allocation2 + $0x5a8] ss:$16 sps:$4 sm:$0xff]   ;;  %v3287_v9 = vld [vmem:[#allocation2 + $0x5e4] ss:$16 sps:$4 sm:$0xff]  }
  0xca   :  { %1525 = vmatprep.subr.bf16.mxu1 %v3200_v10  ;;  %v3290_v10 = vld [vmem:[#allocation2 + $0x5cc] ss:$16 sps:$4 sm:$0xff]  }
  0xcb   :  { %1364 = vmatmul.mubr.bf16.vlgmr.msra.gmra.mrb[0].mxu0 %v2618_v11 }
  0xcc   :  { %1373 = vmatpush1.bf16.msra.mxu0 %v3195_v12  ;;  %1404 = vmatprep.mubr.bf16.mxu0 %v2621_v17  ;;  %v3288_v12 = vld [vmem:[#allocation2 + $0x5c8] ss:$16 sps:$4 sm:$0xff]  }
  0xcd   :  { %1526 = vmatpush1.bf16.msra.mxu1 %v3198_v13  ;;  %1374 = vmatprep.subr.bf16.mxu0 %v3203_v14  ;;  %v3295_v13 = vld [vmem:[#allocation2 + $0x5ec] ss:$16 sps:$4 sm:$0xff]  }
  0xce   :  { %1536 = vmatprep.subr.bf16.mxu1 %v3206_v15  ;;  %v3301_v14 = vld [vmem:[%s3952_s2 + $0x4] ss:$8 sps:$4 sm:$0xff]   ;;  %v2620_v15 = vcombine.low %v3673_v16, %v3673_v16  ;;  %v3302_v16 = vld [vmem:[%s3952_s2 + $0x10] ss:$8 sps:$4 sm:$0xff]  }
  0xd0   :  { %1528 = vmatmul.mubr.bf16.vlgmr.msra.gmra.mrb[4].mxu1 %v2618_v11  ;;  %1375 = vmatpush1.bf16.msra.mxu0 %v3201_v18  ;;  %v3285_v11 = vld [vmem:[#allocation2 + $0x5e0] ss:$16 sps:$4 sm:$0xff]  }
  0xd1   :  { %1537 = vmatpush1.bf16.msra.mxu1 %v3204_v19  ;;  %1376 = vmatprep.subr.bf16.mxu0 %v3209_v20  ;;  %v3299_v18 = vld [vmem:[%s3952_s2] ss:$8 sps:$4 sm:$0xff]   ;;  %v3298_v19 = vld [vmem:[#allocation2 + $0x60c] ss:$16 sps:$4 sm:$0xff]  }
  0xd2   :  { %1538 = vmatprep.subr.bf16.mxu1 %v3212_v21  ;;  %1568 = vmatprep.mubr.bf16.mxu1 %v2621_v17  ;;  %v3293_v17 = vld [vmem:[#allocation2 + $0x5e8] ss:$16 sps:$4 sm:$0xff]   ;;  %v3304_v20 = vld [vmem:[%s3952_s2 + $0x14] ss:$8 sps:$4 sm:$0xff]  }
  0xd3   :  { %v3296_v21 = vld [vmem:[#allocation2 + $0x608] ss:$16 sps:$4 sm:$0xff]  }
  0xd4   :  { %1377 = vmatpush1.bf16.msra.mxu0 %v3207_v22  ;;  %v3307_v22 = vld [vmem:[%s3952_s2 + $0x24] ss:$8 sps:$4 sm:$0xff]  }
  0xd5   :  { %1539 = vmatpush1.bf16.msra.mxu1 %v3210_v23  ;;  %1378 = vmatprep.subr.bf16.mxu0 %v3215_v24  ;;  %v3305_v23 = vld [vmem:[%s3952_s2 + $0x20] ss:$8 sps:$4 sm:$0xff]   ;;  %v3310_v24 = vld [vmem:[%s3952_s2 + $0x34] ss:$8 sps:$4 sm:$0xff]  }
  0xd6   :  { %1540 = vmatprep.subr.bf16.mxu1 %v3218_v25  ;;  %v3308_v25 = vld [vmem:[%s3952_s2 + $0x30] ss:$8 sps:$4 sm:$0xff]  }
  0xd8   :  { %1379 = vmatpush1.bf16.msra.mxu0 %v3213_v26  ;;  %v3311_v26 = vld [vmem:[%s3952_s2 + $0x40] ss:$8 sps:$4 sm:$0xff]  }
  0xd9   :  { %1541 = vmatpush1.bf16.msra.mxu1 %v3216_v27  ;;  %1380 = vmatprep.subr.bf16.mxu0 %v3221_v28  ;;  %v3433_v27 = vld [vmem:[%s3950_s0 + $0x18] ss:$0 sps:$4 sm:$0xff]  }
  0xda   :  { %1542 = vmatprep.subr.bf16.mxu1 %v3224_v29 }
  0xdc   :  { %1381 = vmatpush1.bf16.msra.mxu0 %v3219_v30 }
  0xdd   :  { %1543 = vmatpush1.bf16.msra.mxu1 %v3222_v31  ;;  %1382 = vmatprep.subr.bf16.mxu0 %v3227_v32  ;;  %v3316_v32 = vld [vmem:[%s3952_s2 + $0x54] ss:$8 sps:$4 sm:$0xff]  }
  0xde   :  { %1544 = vmatprep.subr.bf16.mxu1 %v3230_v33  ;;  %v3314_v33 = vld [vmem:[%s3952_s2 + $0x50] ss:$8 sps:$4 sm:$0xff]  }
  0xe0   :  { %1383 = vmatpush1.bf16.msra.mxu0 %v3225_v34  ;;  %v3319_v34 = vld [vmem:[%s3952_s2 + $0x64] ss:$8 sps:$4 sm:$0xff]  }
  0xe1   :  { %1545 = vmatpush1.bf16.msra.mxu1 %v3228_v35  ;;  %1384 = vmatprep.subr.bf16.mxu0 %v3233_v36  ;;  %v3317_v35 = vld [vmem:[%s3952_s2 + $0x60] ss:$8 sps:$4 sm:$0xff]   ;;  %v3322_v36 = vld [vmem:[%s3952_s2 + $0x74] ss:$8 sps:$4 sm:$0xff]  }
  0xe2   :  { %1546 = vmatprep.subr.bf16.mxu1 %v3236_v37  ;;  %v3320_v37 = vld [vmem:[%s3952_s2 + $0x70] ss:$8 sps:$4 sm:$0xff]  }
  0xe4   :  { %1385 = vmatpush1.bf16.msra.mxu0 %v3231_v38  ;;  %v3325_v38 = vld [vmem:[%s3952_s2 + $0x84] ss:$8 sps:$4 sm:$0xff]  }
  0xe5   :  { %1547 = vmatpush1.bf16.msra.mxu1 %v3234_v39  ;;  %1386 = vmatprep.subr.bf16.mxu0 %v3239_v40  ;;  %v3323_v39 = vld [vmem:[%s3952_s2 + $0x80] ss:$8 sps:$4 sm:$0xff]   ;;  %v3328_v40 = vld [vmem:[%s3952_s2 + $0x94] ss:$8 sps:$4 sm:$0xff]  }
  0xe6   :  { %1548 = vmatprep.subr.bf16.mxu1 %v3242_v41  ;;  %v3326_v41 = vld [vmem:[%s3952_s2 + $0x90] ss:$8 sps:$4 sm:$0xff]  }
  0xe8   :  { %1387 = vmatpush1.bf16.msra.mxu0 %v3237_v42  ;;  %v3331_v42 = vld [vmem:[%s3952_s2 + $0xa4] ss:$8 sps:$4 sm:$0xff]  }
  0xe9   :  { %1549 = vmatpush1.bf16.msra.mxu1 %v3240_v43  ;;  %1388 = vmatprep.subr.bf16.mxu0 %v3245_v44  ;;  %v3329_v43 = vld [vmem:[%s3952_s2 + $0xa0] ss:$8 sps:$4 sm:$0xff]   ;;  %v3334_v44 = vld [vmem:[%s3952_s2 + $0xb4] ss:$8 sps:$4 sm:$0xff]  }
  0xea   :  { %1550 = vmatprep.subr.bf16.mxu1 %v3248_v45  ;;  %v3332_v45 = vld [vmem:[%s3952_s2 + $0xb0] ss:$8 sps:$4 sm:$0xff]  }
  0xec   :  { %1389 = vmatpush1.bf16.msra.mxu0 %v3243_v46  ;;  %v3337_v46 = vld [vmem:[%s3952_s2 + $0xc4] ss:$8 sps:$4 sm:$0xff]  }
  0xed   :  { %1551 = vmatpush1.bf16.msra.mxu1 %v3246_v47  ;;  %1390 = vmatprep.subr.bf16.mxu0 %v3251_v48  ;;  %v3335_v47 = vld [vmem:[%s3952_s2 + $0xc0] ss:$8 sps:$4 sm:$0xff]   ;;  %v3340_v48 = vld [vmem:[%s3952_s2 + $0xd4] ss:$8 sps:$4 sm:$0xff]  }
  0xee   :  { %1552 = vmatprep.subr.bf16.mxu1 %v3254_v49  ;;  %v3338_v49 = vld [vmem:[%s3952_s2 + $0xd0] ss:$8 sps:$4 sm:$0xff]  }
  0xf0   :  { %1391 = vmatpush1.bf16.msra.mxu0 %v3249_v50  ;;  %v3343_v50 = vld [vmem:[%s3952_s2 + $0xe4] ss:$8 sps:$4 sm:$0xff]  }
  0xf1   :  { %1553 = vmatpush1.bf16.msra.mxu1 %v3252_v51  ;;  %1392 = vmatprep.subr.bf16.mxu0 %v3257_v52  ;;  %v3341_v51 = vld [vmem:[%s3952_s2 + $0xe0] ss:$8 sps:$4 sm:$0xff]   ;;  %v3346_v52 = vld [vmem:[%s3952_s2 + $0xf4] ss:$8 sps:$4 sm:$0xff]  }
  0xf2   :  { %1554 = vmatprep.subr.bf16.mxu1 %v3260_v53  ;;  %v3344_v53 = vld [vmem:[%s3952_s2 + $0xf0] ss:$8 sps:$4 sm:$0xff]  }
  0xf4   :  { %1393 = vmatpush1.bf16.msra.mxu0 %v3255_v54  ;;  %v3349_v54 = vld [vmem:[%s3952_s2 + $0x104] ss:$8 sps:$4 sm:$0xff]  }
  0xf5   :  { %1555 = vmatpush1.bf16.msra.mxu1 %v3258_v55  ;;  %1394 = vmatprep.subr.bf16.mxu0 %v3263_v56 }
  0xf6   :  { %1556 = vmatprep.subr.bf16.mxu1 %v3266_v57 }
  0xf8   :  { %1395 = vmatpush1.bf16.msra.mxu0 %v3261_v58 }
  0xf9   :  { %1557 = vmatpush1.bf16.msra.mxu1 %v3264_v59  ;;  %1396 = vmatprep.subr.bf16.mxu0 %v3269_v60 }
  0xfa   :  { %1558 = vmatprep.subr.bf16.mxu1 %v3272_v61 }
  0xfc   :  { %1397 = vmatpush1.bf16.msra.mxu0 %v3267_v62 }
  0xfd   :  { %1559 = vmatpush1.bf16.msra.mxu1 %v3270_v63  ;;  %1398 = vmatprep.subr.bf16.mxu0 %v3275_v1 }
  0xfe   :  { %1560 = vmatprep.subr.bf16.mxu1 %v3278_v2 }
 0x100   :  { %1399 = vmatpush1.bf16.msra.mxu0 %v3273_v3 }
 0x101   :  { %1561 = vmatpush1.bf16.msra.mxu1 %v3276_v4  ;;  %1400 = vmatprep.subr.bf16.mxu0 %v3281_v5 }
 0x102   :  { %1562 = vmatprep.subr.bf16.mxu1 %v3284_v6 }
 0x104   :  { %1401 = vmatpush1.bf16.msra.mxu0 %v3279_v7 }
 0x105   :  { %1563 = vmatpush1.bf16.msra.mxu1 %v3282_v8  ;;  %1402 = vmatprep.subr.bf16.mxu0 %v3287_v9 }
 0x106   :  { %1564 = vmatprep.subr.bf16.mxu1 %v3290_v10 }
 0x108   :  { %1403 = vmatpush1.bf16.msra.mxu0 %v3285_v11 }
 0x109   :  { %1565 = vmatpush1.bf16.msra.mxu1 %v3288_v12  ;;  %2138 = vmatprep.subr.bf16.mxu0 %v3301_v14 }
 0x10a   :  { %1566 = vmatprep.subr.bf16.mxu1 %v3295_v13 }
 0x10b   :  { %1405 = vmatmul.mubr.bf16.vlgmr.msra.gmra.mrb[0].mxu0 %v2620_v15 }
 0x10c   :  { %2139 = vmatpush1.bf16.msra.mxu0 %v3299_v18 }
 0x10d   :  { %1567 = vmatpush1.bf16.msra.mxu1 %v3293_v17  ;;  %2140 = vmatprep.subr.bf16.mxu0 %v3304_v20 }
 0x10e   :  { %1577 = vmatprep.subr.bf16.mxu1 %v3298_v19 }
 0x110   :  { %1569 = vmatmul.mubr.bf16.vlgmr.msra.gmra.mrb[4].mxu1 %v2620_v15  ;;  %2141 = vmatpush1.bf16.msra.mxu0 %v3302_v16 }
 0x111   :  { %1578 = vmatpush1.bf16.msra.mxu1 %v3296_v21  ;;  %1609 = vmatprep.mubr.bf16.mxu1 %v3560_v0  ;;  %v3313_v0 = vld [vmem:[%s3952_s2 + $0x44] ss:$8 sps:$4 sm:$0xff]  }
 0x112   :  { %2142 = vmatprep.subr.bf16.mxu0 %v3307_v22 }
 0x114   :  { %2143 = vmatpush1.bf16.msra.mxu0 %v3305_v23 }
 0x115   :  { %2144 = vmatprep.subr.bf16.mxu0 %v3310_v24 }
 0x118   :  { %2145 = vmatpush1.bf16.msra.mxu0 %v3308_v25 }
 0x119   :  { %2146 = vmatprep.subr.bf16.mxu0 %v3313_v0 }
 0x11c   :  { %2820 = vmatmul.mubr.msk.bf16.vlgmr.msra.gmra.mrb[4].mxu1 %vm1286_vm0, %v3433_v27  ;;  %2147 = vmatpush1.bf16.msra.mxu0 %v3311_v26 }
 0x11d   :  { %2148 = vmatprep.subr.bf16.mxu0 %v3316_v32 }
 0x120   :  { %2149 = vmatpush1.bf16.msra.mxu0 %v3314_v33 }
 0x121   :  { %2150 = vmatprep.subr.bf16.mxu0 %v3319_v34 }
 0x123   :  { %v1447_v28 = vpop.f32.mrb[0].mxu1 }
 0x124   :  { %v1449_v29 = vpop.f32.mrb[1].mxu1  ;;  %2151 = vmatpush1.bf16.msra.mxu0 %v3317_v35 }
 0x125   :  { %v1451_v30 = vpop.f32.mrb[2].mxu1  ;;  %2152 = vmatprep.subr.bf16.mxu0 %v3322_v36 }
 0x126   :  { %v1452_v31 = vpop.f32.mrb[3].mxu1 }
 0x128   :  { %2153 = vmatpush1.bf16.msra.mxu0 %v3320_v37 }
 0x129   :  { %2154 = vmatprep.subr.bf16.mxu0 %v3325_v38 }
 0x12c   :  { %2155 = vmatpush1.bf16.msra.mxu0 %v3323_v39 }
 0x12d   :  { %2156 = vmatprep.subr.bf16.mxu0 %v3328_v40 }
 0x130   :  { %2157 = vmatpush1.bf16.msra.mxu0 %v3326_v41 }
 0x131   :  { %2158 = vmatprep.subr.bf16.mxu0 %v3331_v42 }
 0x134   :  { %2159 = vmatpush1.bf16.msra.mxu0 %v3329_v43 }
 0x135   :  { %2160 = vmatprep.subr.bf16.mxu0 %v3334_v44 }
 0x138   :  { %2161 = vmatpush1.bf16.msra.mxu0 %v3332_v45 }
 0x139   :  { %2162 = vmatprep.subr.bf16.mxu0 %v3337_v46 }
 0x13c   :  { %2163 = vmatpush1.bf16.msra.mxu0 %v3335_v47  ;;  %v1706_v47 = vlaneseq }
 0x13d   :  { %2164 = vmatprep.subr.bf16.mxu0 %v3340_v48 }
 0x140   :  { %2165 = vmatpush1.bf16.msra.mxu0 %v3338_v49 }
 0x141   :  { %2166 = vmatprep.subr.bf16.mxu0 %v3343_v50 }
 0x144   :  { %2167 = vmatpush1.bf16.msra.mxu0 %v3341_v51 }
 0x145   :  { %2168 = vmatprep.subr.bf16.mxu0 %v3346_v52 }
 0x148   :  { %2169 = vmatpush1.bf16.msra.mxu0 %v3344_v53 }
 0x149   :  { %2179 = vmatprep.subr.bf16.mxu0 %v3349_v54 }
 0x1de   :  { %v1406_v55 = vpop.f32.mrb[0].mxu0 }
 0x1df   :  { %v3783_v56 = vadd.f32 %v1447_v28, %v1406_v55  ;;  %v1408_v57 = vpop.f32.mrb[1].mxu0 }
 0x1e0   :  { %v3785_v58 = vadd.f32 %v1449_v29, %v1408_v57  ;;  %v1410_v59 = vpop.f32.mrb[2].mxu0 }
 0x1e1   :  { %v1618_v60 = vrot.slane %v3783_v56, 4  ;;  %v1646_v61 = vmul.f32 %v3783_v56, %v3783_v56  ;;  %v1411_v62 = vpop.f32.mrb[3].mxu0 }
 0x1e2   :  { %v1624_v63 = vrot.slane %v3785_v58, 4  ;;  %v1647_v1 = vmul.f32 %v3785_v58, %v3785_v58 }
 0x1e3   :  { %v1619_v2 = vadd.f32 %v3783_v56, %v1618_v60  ;;  %v1650_v3 = vrot.slane %v1646_v61, 4  ;;  %v3815_v60 = vshrl.u32 %v1706_v47, 7 }
 0x1e4   :  { %v1625_v4 = vadd.f32 %v3785_v58, %v1624_v63  ;;  %v1656_v5 = vrot.slane %v1647_v1, 4 }
 0x1e5   :  { %v1620_v6 = vrot.slane %v1619_v2, 2  ;;  %v1651_v7 = vadd.f32 %v1650_v3, %v1646_v61 }
 0x1e6   :  { %v1626_v8 = vrot.slane %v1625_v4, 2  ;;  %v1657_v9 = vadd.f32 %v1656_v5, %v1647_v1 }
 0x1e7   :  { %v1621_v10 = vadd.f32 %v1620_v6, %v1619_v2  ;;  %v1652_v11 = vrot.slane %v1651_v7, 2  ;;  %v1708_v6 = vsub.s32 0, %v3815_v60 }
 0x1e8   :  { %v1627_v12 = vadd.f32 %v1626_v8, %v1625_v4  ;;  %v1658_v13 = vrot.slane %v1657_v9, 2 }
 0x1e9   :  { %v1622_v14 = vrot.slane %v1621_v10, 1  ;;  %v1653_v15 = vadd.f32 %v1652_v11, %v1651_v7 }
 0x1ea   :  { %v1628_v17 = vrot.slane %v1627_v12, 1  ;;  %v1659_v18 = vadd.f32 %v1658_v13, %v1657_v9  ;;  %v1728_v13 = vsub.s32 1, %v3815_v60 }
 0x1eb   :  { %v1623_v19 = vadd.f32 %v1622_v14, %v1621_v10  ;;  %v1654_v20 = vrot.slane %v1653_v15, 1  ;;  %v3818_v10 = vld [vmem:[#allocation8] sm:$0xff] }
 0x1ec   :  { %v1629_v21 = vadd.f32 %v1628_v17, %v1627_v12  ;;  %v1660_v16 = vrot.slane %v1659_v18, 1  ;;  %v3820_v12 = vld [vmem:[#allocation8 + $0x8] sm:$0xff] }
 0x1ed   :  { %v3795_v22 = vmul.f32 0.125, %v1623_v19  ;;  %v1655_v23 = vadd.f32 %v1654_v20, %v1653_v15  ;;  %v1709_v19 = vrot.slane %v3818_v10, %v1708_v6 }
 0x1ee   :  { %v3797_v24 = vmul.f32 0.125, %v1629_v21  ;;  %v1661_v25 = vadd.f32 %v1660_v16, %v1659_v18 }
 0x1ef   :  { %v3799_v0 = vpop.f32.mrb[4].mxu1  ;;  %v1674_v26 = vmul.f32 0.125, %v1655_v23  ;;  %v1678_v27 = vmul.f32 %v3795_v22, %v3795_v22  ;;  %v1690_v17 = vsub.f32 %v3783_v56, %v3795_v22  ;;  %v1713_v23 = vrot.slane %v3820_v12, %v1708_v6 }
 0x1f0   :  { %v1630_v28 = vrot.slane %v3799_v0, 4  ;;  %v3804_v29 = vpop.f32.mrb[5].mxu1  ;;  %v1675_v30 = vmul.f32 0.125, %v1661_v25  ;;  %v1679_v31 = vmul.f32 %v3797_v24, %v3797_v24  ;;  %v1648_v32 = vmul.f32 %v3799_v0, %v3799_v0 }
 0x1f1   :  { %v1615_v33 = vpop.f32.mrb[6].mxu1  ;;  %v1682_v34 = vsub.f32 %v1674_v26, %v1678_v27  ;;  %v1636_v36 = vrot.slane %v3804_v29, 4  ;;  %v1649_v37 = vmul.f32 %v3804_v29, %v3804_v29  ;;  %v1691_v21 = vsub.f32 %v3785_v58, %v3797_v24 }
 0x1f2   :  { %v1631_v35 = vadd.f32 %v1630_v28, %v3799_v0  ;;  %v1616_v38 = vpop.f32.mrb[7].mxu1  ;;  %v1683_v39 = vsub.f32 %v1675_v30, %v1679_v31  ;;  %v1662_v40 = vrot.slane %v1648_v32, 4  ;;  %v1729_v28 = vrot.slane %v3818_v10, %v1728_v13 }
 0x1f3   :  { %v1686_v41 = vmax.f32 %v1682_v34, 0.0  ;;  %v1637_v43 = vadd.f32 %v1636_v36, %v3804_v29  ;;  %v1668_v44 = vrot.slane %v1649_v37, 4  ;;  %v3347_v38 = vld [vmem:[%s3952_s2 + $0x100] ss:$8 sps:$4 sm:$0xff]  }
 0x1f4   :  { %v1632_v42 = vrot.slane %v1631_v35, 2  ;;  %v1687_v45 = vmax.f32 %v1683_v39, 0.0  ;;  %v1663_v46 = vadd.f32 %v1662_v40, %v1648_v32  ;;  %v1733_v32 = vrot.slane %v3820_v12, %v1728_v13  ;;  %v80_v39 = vld [vmem:[#allocation8 + $0x10] sm:$0xff] }
 0x1f5   :  { %v1694_v48 = vadd.f32 1e-05, %v1686_v41  ;;  %v1638_v50 = vrot.slane %v1637_v43, 2  ;;  %v1669_v51 = vadd.f32 %v1668_v44, %v1649_v37  ;;  %v3352_v41 = vld [vmem:[%s3952_s2 + $0x114] ss:$8 sps:$4 sm:$0xff]   ;;  %v1717_v44 = vrot.slane %v80_v39, %v1708_v6 }
 0x1f6   :  { %v1633_v49 = vadd.f32 %v1632_v42, %v1631_v35  ;;  %v1695_v52 = vadd.f32 1e-05, %v1687_v45  ;;  %v1664_v53 = vrot.slane %v1663_v46, 2  ;;  %v81_v42 = vld [vmem:[#allocation8 + $0x18] sm:$0xff] }
 0x1f7   :  { %3419 = vrsqrt.f32 %v1694_v48  ;;  %v1639_v55 = vadd.f32 %v1638_v50, %v1637_v43  ;;  %v1670_v57 = vrot.slane %v1669_v51, 2  ;;  %v3350_v45 = vld [vmem:[%s3952_s2 + $0x110] ss:$8 sps:$4 sm:$0xff]   ;;  %v3355_v48 = vld [vmem:[%s3952_s2 + $0x124] ss:$8 sps:$4 sm:$0xff]  }
 0x1f8   :  { %v1634_v54 = vrot.slane %v1633_v49, 1  ;;  %3421 = vrsqrt.f32 %v1695_v52  ;;  %v1665_v59 = vadd.f32 %v1664_v53, %v1663_v46  ;;  %v1737_v52 = vrot.slane %v80_v39, %v1728_v13  ;;  %v3405_v39 = vld [vmem:[#allocation5 + $0x68] sm:$0xff]  }
 0x1f9   :  { %v1640_v62 = vrot.slane %v1639_v55, 1  ;;  %v1671_v63 = vadd.f32 %v1670_v57, %v1669_v51 }
 0x1fa   :  { %v1635_v61 = vadd.f32 %v1634_v54, %v1633_v49  ;;  %v1666_v1 = vrot.slane %v1665_v59, 1  ;;  %v1721_v49 = vrot.slane %v81_v42, %v1708_v6  ;;  %v3367_v6 = vld [vmem:[%s3952_s2 + $0x164] ss:$8 sps:$4 sm:$0xff]  }
 0x1fb   :  { %v1641_v3 = vadd.f32 %v1640_v62, %v1639_v55  ;;  %v1672_v4 = vrot.slane %v1671_v63, 1  ;;  %v3353_v55 = vld [vmem:[%s3952_s2 + $0x120] ss:$8 sps:$4 sm:$0xff]   ;;  %v3356_v62 = vld [vmem:[%s3952_s2 + $0x130] ss:$8 sps:$4 sm:$0xff]  }
 0x1fc   :  { %v1644_v2 = vmul.f32 0.125, %v1635_v61  ;;  %v1667_v5 = vadd.f32 %v1666_v1, %v1665_v59  ;;  %v3361_v1 = vld [vmem:[%s3952_s2 + $0x144] ss:$8 sps:$4 sm:$0xff]  }
 0x1fd   :  { %v1645_v8 = vmul.f32 0.125, %v1641_v3  ;;  %v1673_v9 = vadd.f32 %v1672_v4, %v1671_v63  ;;  %v3359_v3 = vld [vmem:[%s3952_s2 + $0x140] ss:$8 sps:$4 sm:$0xff]   ;;  %v3364_v4 = vld [vmem:[%s3952_s2 + $0x154] ss:$8 sps:$4 sm:$0xff]  }
 0x1fe   :  { %v1680_v7 = vmul.f32 %v1644_v2, %v1644_v2  ;;  %v1676_v11 = vmul.f32 0.125, %v1667_v5  ;;  %v1692_v43 = vsub.f32 %v3799_v0, %v1644_v2  ;;  %v1741_v0 = vrot.slane %v81_v42, %v1728_v13  ;;  %v3362_v5 = vld [vmem:[%s3952_s2 + $0x150] ss:$8 sps:$4 sm:$0xff]   ;;  %v3371_v13 = vld [vmem:[%s3952_s2 + $0x180] ss:$8 sps:$4 sm:$0xff]  }
 0x1ff   :  { %v1677_v14 = vmul.f32 0.125, %v1673_v9  ;;  %v1681_v15 = vmul.f32 %v1645_v8, %v1645_v8  ;;  %v1693_v47 = vsub.f32 %v3804_v29, %v1645_v8  ;;  %v3358_v29 = vld [vmem:[%s3952_s2 + $0x134] ss:$8 sps:$4 sm:$0xff]   ;;  %v3368_v9 = vld [vmem:[%s3952_s2 + $0x170] ss:$8 sps:$4 sm:$0xff]  }
 0x200   :  { %v1684_v18 = vsub.f32 %v1676_v11, %v1680_v7  ;;  %v3365_v7 = vld [vmem:[%s3952_s2 + $0x160] ss:$8 sps:$4 sm:$0xff]   ;;  %v3370_v8 = vld [vmem:[%s3952_s2 + $0x174] ss:$8 sps:$4 sm:$0xff]   ;;  %v3373_v11 = vld [vmem:[%s3952_s2 + $0x184] ss:$8 sps:$4 sm:$0xff]  }
 0x201   :  { %v3420_v20 = vpop.eup %3419  ;;  %v1685_v16 = vsub.f32 %v1677_v14, %v1681_v15  ;;  %v3376_v14 = vld [vmem:[%s3952_s2 + $0x194] ss:$8 sps:$4 sm:$0xff]   ;;  %v3374_v15 = vld [vmem:[%s3952_s2 + $0x190] ss:$8 sps:$4 sm:$0xff]  }
 0x202   :  { %v3422_v25 = vpop.eup %3421  ;;  %v1702_v26 = vmul.f32 %v3420_v20, %v1690_v17  ;;  %v1688_v27 = vmax.f32 %v1684_v18, 0.0  ;;  %v3379_v17 = vld [vmem:[%s3952_s2 + $0x1a4] ss:$8 sps:$4 sm:$0xff]   ;;  %v3377_v18 = vld [vmem:[%s3952_s2 + $0x1a0] ss:$8 sps:$4 sm:$0xff]   ;;  %v3408_v42 = vld [vmem:[#allocation5 + $0x30] sm:$0xff]  }
 0x203   :  { %v1689_v30 = vmax.f32 %v1685_v16, 0.0  ;;  %v1703_v31 = vmul.f32 %v3422_v25, %v1691_v21  ;;  %v3380_v20 = vld [vmem:[%s3952_s2 + $0x1b0] ss:$8 sps:$4 sm:$0xff]   ;;  %v3385_v21 = vld [vmem:[%s3952_s2 + $0x1c4] ss:$8 sps:$4 sm:$0xff]  }
 0x204   :  { %v1696_v56 = vadd.f32 1e-05, %v1688_v27  ;;  %v1722_v22 = vmul.f32 %v1709_v19, %v1702_v26  ;;  %v3382_v19 = vld [vmem:[%s3952_s2 + $0x1b4] ss:$8 sps:$4 sm:$0xff]   ;;  %v3383_v16 = vld [vmem:[%s3952_s2 + $0x1c0] ss:$8 sps:$4 sm:$0xff]  }
 0x205   :  { %v1697_v33 = vadd.f32 1e-05, %v1689_v30  ;;  %v1723_v34 = vmul.f32 %v1713_v23, %v1703_v31  ;;  %v3388_v23 = vld [vmem:[%s3952_s2 + $0x1d4] ss:$8 sps:$4 sm:$0xff]   ;;  %v3386_v25 = vld [vmem:[%s3952_s2 + $0x1d0] ss:$8 sps:$4 sm:$0xff]  }
 0x206   :  { %3423 = vrsqrt.f32 %v1696_v56  ;;  %v1742_v35 = vadd.f32 %v1729_v28, %v1722_v22  ;;  %v3391_v26 = vld [vmem:[%s3952_s2 + $0x1e4] ss:$8 sps:$4 sm:$0xff]   ;;  %v3389_v27 = vld [vmem:[%s3952_s2 + $0x1e0] ss:$8 sps:$4 sm:$0xff]   ;;  %v3394_v28 = vld [vmem:[%s3952_s2 + $0x1f4] ss:$8 sps:$4 sm:$0xff]  }
 0x207   :  { %3425 = vrsqrt.f32 %v1697_v33  ;;  %v1743_v58 = vadd.f32 %v1733_v32, %v1723_v34  ;;  %v3392_v30 = vld [vmem:[%s3952_s2 + $0x1f0] ss:$8 sps:$4 sm:$0xff]   ;;  %v3395_v56 = vld [vmem:[#allocation5 + $0x40] sm:$0xff]   ;;  %v3397_v33 = vld [vmem:[#allocation5 + $0x48] sm:$0xff]   ;;  %s3563_s2 = smov [#allocation10]  }
 0x208   :  { %v1746_v24 = vmax.f32 %v1742_v35, 0.0  ;;  %v3396_v22 = vld [vmem:[#allocation5] sm:$0xff]   ;;  %2909 = vmatprep.subr.bf16.mxu1 %v3395_v56  ;;  %v3398_v34 = vld [vmem:[#allocation5 + $0x8] sm:$0xff]   ;;  %v3399_v35 = vld [vmem:[#allocation5 + $0x50] sm:$0xff]   ;;  %s2605_s19 = sshll.u32 %s3563_s2, 4  ;;  %s2606_s19 = int_to_ptr.vmem [resolvable:$true] %s2605_s19 }
 0x209   :  { %v1747_v36 = vmax.f32 %v1743_v58, 0.0  ;;  %2910 = vmatpush3.bf16.msra.mxu1 %v3396_v22  ;;  %v3400_v58 = vld [vmem:[#allocation5 + $0x10] sm:$0xff]   ;;  %s3522_s20 = scalar_lea.vmem %s2606_s19, 128  ;;  %p3527_p5 = scmp.lt.s32.totalorder %s2606_s19, %s2606_s19 }
 0x20a   :  { %v1750_v40 = vpack.c.bf16 %v1746_v24, %v1746_v24  ;;  %2911 = vmatprep.subr.bf16.mxu1 %v3397_v33  ;;  %v3401_v24 = vld [vmem:[#allocation5 + $0x58] sm:$0xff]   ;;  %p3523_p4 = scmp.ne.s32.totalorder %s2606_s19, %s3522_s20  ;;  %p3528_p6 = scmp.lt.s32.totalorder %s3522_s20, %s3522_s20 }
 0x20b   :  { %v1751_v37 = vpack.c.bf16 %v1747_v36, %v1747_v36  ;;  %v3402_v36 = vld [vmem:[#allocation5 + $0x18] sm:$0xff]  }
 0x20c   :  { %p3529_p7 = por %p3528_p6, %p3527_p5 }
 0x20d   :  { %2170 = vmatprep.mubr.bf16.mxu0 %v1751_v37  ;;  %2912 = vmatpush3.bf16.msra.mxu1 %v3398_v34  ;;  %v3403_v37 = vld [vmem:[#allocation5 + $0x60] sm:$0xff]  }
 0x20e   :  { %2171 = vmatmul.mubr.bf16.vlgmr.msra.gmra.mrb[4].mxu0 %v1750_v40  ;;  %2913 = vmatprep.subr.bf16.mxu1 %v3399_v35  ;;  %v3406_v40 = vld [vmem:[#allocation5 + $0x28] sm:$0xff]   ;;  %p3530_p8 = pnand %p3529_p7, %p3523_p4 }
 0x20f   :  { %2180 = vmatpush1.bf16.msra.mxu0 %v3347_v38  ;;  %v3404_v38 = vld [vmem:[#allocation5 + $0x20] sm:$0xff]  }
 0x210   :  { %v3424_v46 = vpop.eup %3423  ;;  %2181 = vmatprep.subr.bf16.mxu0 %v3352_v41  ;;  %v3407_v41 = vld [vmem:[#allocation5 + $0x70] sm:$0xff]  }
 0x211   :  { %v3426_v50 = vpop.eup %3425  ;;  %v1704_v51 = vmul.f32 %v3424_v46, %v1692_v43  ;;  %2914 = vmatpush3.bf16.msra.mxu1 %v3400_v58  ;;  %v3409_v43 = vld [vmem:[#allocation5 + $0x78] sm:$0xff]  }
 0x212   :  { %v1705_v53 = vmul.f32 %v3426_v50, %v1693_v47  ;;  %2915 = vmatprep.subr.bf16.mxu1 %v3401_v24 }
 0x213   :  { %v1724_v54 = vmul.f32 %v1717_v44, %v1704_v51  ;;  %2182 = vmatpush1.bf16.msra.mxu0 %v3350_v45  ;;  %v3410_v44 = vld [vmem:[#allocation5 + $0x38] sm:$0xff]  }
 0x214   :  { %2183 = vmatprep.subr.bf16.mxu0 %v3355_v48  ;;  %v1725_v57 = vmul.f32 %v1721_v49, %v1705_v53 }
 0x215   :  { %v1744_v59 = vadd.f32 %v1737_v52, %v1724_v54  ;;  %2916 = vmatpush3.bf16.msra.mxu1 %v3402_v36 }
 0x216   :  { %v1745_v61 = vadd.f32 %v1741_v0, %v1725_v57  ;;  %2917 = vmatprep.subr.bf16.mxu1 %v3403_v37 }
 0x217   :  { %2184 = vmatpush1.bf16.msra.mxu0 %v3353_v55  ;;  %v1748_v31 = vmax.f32 %v1744_v59, 0.0 }
 0x218   :  { %2185 = vmatprep.subr.bf16.mxu0 %v3358_v29  ;;  %v1749_v63 = vmax.f32 %v1745_v61, 0.0 }
 0x219   :  { %v1752_v32 = vpack.c.bf16 %v1748_v31, %v1748_v31  ;;  %2918 = vmatpush3.bf16.msra.mxu1 %v3404_v38  ;;  %v2276_v31 = vsub.s32 3, %v3815_v60 }
 0x21a   :  { %v1753_v2 = vpack.c.bf16 %v1749_v63, %v1749_v63  ;;  %2919 = vmatprep.subr.bf16.mxu1 %v3405_v39 }
 0x21b   :  { %2186 = vmatpush1.bf16.msra.mxu0 %v3356_v62  ;;  %v2277_v24 = vrot.slane %v3818_v10, %v2276_v31  ;;  %v2281_v37 = vrot.slane %v3820_v12, %v2276_v31 }
 0x21c   :  { %2211 = vmatprep.mubr.bf16.mxu0 %v1753_v2  ;;  %2187 = vmatprep.subr.bf16.mxu0 %v3361_v1 }
 0x21d   :  { %2920 = vmatpush3.bf16.msra.mxu1 %v3406_v40 }
 0x21e   :  { %2921 = vmatprep.subr.bf16.mxu1 %v3407_v41 }
 0x21f   :  { %2188 = vmatpush1.bf16.msra.mxu0 %v3359_v3 }
 0x220   :  { %2189 = vmatprep.subr.bf16.mxu0 %v3364_v4 }
 0x221   :  { %2922 = vmatpush3.bf16.msra.mxu1 %v3408_v42 }
 0x222   :  { %2923 = vmatprep.subr.bf16.mxu1 %v3409_v43 }
 0x223   :  { %2190 = vmatpush1.bf16.msra.mxu0 %v3362_v5 }
 0x224   :  { %2191 = vmatprep.subr.bf16.mxu0 %v3367_v6 }
 0x225   :  { %2924 = vmatpush3.bf16.msra.mxu1 %v3410_v44 }
 0x227   :  { %2192 = vmatpush1.bf16.msra.mxu0 %v3365_v7 }
 0x228   :  { %2193 = vmatprep.subr.bf16.mxu0 %v3370_v8 }
 0x22b   :  { %2194 = vmatpush1.bf16.msra.mxu0 %v3368_v9 }
 0x22c   :  { %2195 = vmatprep.subr.bf16.mxu0 %v3373_v11 }
 0x22f   :  { %2196 = vmatpush1.bf16.msra.mxu0 %v3371_v13 }
 0x230   :  { %2197 = vmatprep.subr.bf16.mxu0 %v3376_v14 }
 0x233   :  { %2198 = vmatpush1.bf16.msra.mxu0 %v3374_v15 }
 0x234   :  { %2199 = vmatprep.subr.bf16.mxu0 %v3379_v17 }
 0x237   :  { %2200 = vmatpush1.bf16.msra.mxu0 %v3377_v18 }
 0x238   :  { %2201 = vmatprep.subr.bf16.mxu0 %v3382_v19 }
 0x23b   :  { %2202 = vmatpush1.bf16.msra.mxu0 %v3380_v20 }
 0x23c   :  { %2203 = vmatprep.subr.bf16.mxu0 %v3385_v21 }
 0x23f   :  { %2204 = vmatpush1.bf16.msra.mxu0 %v3383_v16 }
 0x240   :  { %2205 = vmatprep.subr.bf16.mxu0 %v3388_v23 }
 0x243   :  { %2206 = vmatpush1.bf16.msra.mxu0 %v3386_v25 }
 0x244   :  { %2207 = vmatprep.subr.bf16.mxu0 %v3391_v26 }
 0x247   :  { %2208 = vmatpush1.bf16.msra.mxu0 %v3389_v27 }
 0x248   :  { %2209 = vmatprep.subr.bf16.mxu0 %v3394_v28 }
 0x24b   :  { %2210 = vmatpush1.bf16.msra.mxu0 %v3392_v30  ;;  %v2266_v30 = vsub.s32 2, %v3815_v60 }
 0x24d   :  { %v2267_v56 = vrot.slane %v3818_v10, %v2266_v30  ;;  %v2271_v34 = vrot.slane %v3820_v12, %v2266_v30  ;;  %v3414_v12 = vld [vmem:[#allocation7 + $0x18] sm:$0xff]  }
 0x24e   :  { %2212 = vmatmul.mubr.bf16.vlgmr.msra.gmra.mrb[4].mxu0 %v1752_v32 }
 0x321   :  { %v2213_v45 = vpop.f32.mrb[4].mxu0 }
 0x322   :  { %v2220_v46 = vrot.slane %v2213_v45, 4  ;;  %v2234_v47 = vmul.f32 %v2213_v45, %v2213_v45  ;;  %v2215_v48 = vpop.f32.mrb[5].mxu0 }
 0x323   :  { %v2226_v49 = vrot.slane %v2215_v48, 4  ;;  %v2235_v50 = vmul.f32 %v2215_v48, %v2215_v48  ;;  %v2217_v51 = vpop.f32.mrb[6].mxu0 }
 0x324   :  { %v2221_v52 = vadd.f32 %v2220_v46, %v2213_v45  ;;  %v2236_v53 = vrot.slane %v2234_v47, 4  ;;  %v2218_v0 = vpop.f32.mrb[7].mxu0  ;;  %v3411_v46 = vld [vmem:[#allocation7] sm:$0xff]   ;;  %v3416_v51 = vld [vmem:[#allocation7 + $0x28] sm:$0xff]  }
 0x325   :  { %v2227_v54 = vadd.f32 %v2226_v49, %v2215_v48  ;;  %v2242_v55 = vrot.slane %v2235_v50, 4  ;;  %v3413_v49 = vld [vmem:[#allocation7 + $0x10] sm:$0xff]  }
 0x326   :  { %v2222_v29 = vrot.slane %v2221_v52, 2  ;;  %v2237_v57 = vadd.f32 %v2236_v53, %v2234_v47  ;;  %v3561_v47 = vmov 0.0   ;;  %v3418_v53 = vld [vmem:[#allocation7 + $0x38] sm:$0xff]  }
 0x327   :  { %v2228_v59 = vrot.slane %v2227_v54, 2  ;;  %v2243_v61 = vadd.f32 %v2242_v55, %v2235_v50  ;;  %2940 = vmatprep.subr.bf16.mxu1 %v3561_v47  ;;  %v3415_v50 = vld [vmem:[#allocation7 + $0x20] sm:$0xff]  }
 0x328   :  { %v2223_v62 = vadd.f32 %v2222_v29, %v2221_v52  ;;  %v2238_v63 = vrot.slane %v2237_v57, 2  ;;  %v3417_v52 = vld [vmem:[#allocation7 + $0x30] sm:$0xff]  }
 0x329   :  { %v2229_v1 = vadd.f32 %v2228_v59, %v2227_v54  ;;  %v2244_v2 = vrot.slane %v2243_v61, 2 }
 0x32a   :  { %v2224_v3 = vrot.slane %v2223_v62, 1  ;;  %v2239_v4 = vadd.f32 %v2238_v63, %v2237_v57 }
 0x32b   :  { %v2230_v5 = vrot.slane %v2229_v1, 1  ;;  %v2245_v6 = vadd.f32 %v2244_v2, %v2243_v61 }
 0x32c   :  { %v2225_v7 = vadd.f32 %v2224_v3, %v2223_v62  ;;  %v2240_v8 = vrot.slane %v2239_v4, 1 }
 0x32d   :  { %v2231_v9 = vadd.f32 %v2230_v5, %v2229_v1  ;;  %v2246_v11 = vrot.slane %v2245_v6, 1 }
 0x32e   :  { %v2232_v13 = vmul.f32 0.125, %v2225_v7  ;;  %v2241_v14 = vadd.f32 %v2240_v8, %v2239_v4 }
 0x32f   :  { %v2233_v15 = vmul.f32 0.125, %v2231_v9  ;;  %v2247_v17 = vadd.f32 %v2246_v11, %v2245_v6 }
 0x330   :  { %v2248_v18 = vmul.f32 0.125, %v2241_v14  ;;  %v2250_v19 = vmul.f32 %v2232_v13, %v2232_v13  ;;  %v2256_v32 = vsub.f32 %v2213_v45, %v2232_v13 }
 0x331   :  { %v2249_v20 = vmul.f32 0.125, %v2247_v17  ;;  %v2251_v21 = vmul.f32 %v2233_v15, %v2233_v15  ;;  %v2257_v33 = vsub.f32 %v2215_v48, %v2233_v15  ;;  %v3412_v48 = vld [vmem:[#allocation7 + $0x8] sm:$0xff]  }
 0x332   :  { %v2252_v16 = vsub.f32 %v2248_v18, %v2250_v19  ;;  %v2480_v19 = vsub.s32 4, %v3815_v60 }
 0x333   :  { %v2253_v23 = vsub.f32 %v2249_v20, %v2251_v21  ;;  %v2485_v20 = vsub.s32 5, %v3815_v60 }
 0x334   :  { %v2254_v25 = vmax.f32 %v2252_v16, 0.0  ;;  %v2481_v16 = vrot.slane %v3818_v10, %v2480_v19 }
 0x335   :  { %v2255_v26 = vmax.f32 %v2253_v23, 0.0 }
 0x336   :  { %v2258_v27 = vadd.f32 1e-05, %v2254_v25 }
 0x337   :  { %v2259_v28 = vadd.f32 1e-05, %v2255_v26  ;;  %v2486_v26 = vrot.slane %v3818_v10, %v2485_v20 }
 0x338   :  { %3427 = vrsqrt.f32 %v2258_v27 }
 0x339   :  { %3429 = vrsqrt.f32 %v2259_v28 }
 0x342   :  { %v3428_v22 = vpop.eup %3427 }
 0x343   :  { %v3430_v35 = vpop.eup %3429  ;;  %v2262_v58 = vmul.f32 %v3428_v22, %v2256_v32  ;;  %v2508_v32 = vsub.s32 6, %v3815_v60 }
 0x344   :  { %v2263_v36 = vmul.f32 %v3430_v35, %v2257_v33 }
 0x345   :  { %v2272_v38 = vmul.f32 %v2267_v56, %v2262_v58  ;;  %v2509_v56 = vrot.slane %v3818_v10, %v2508_v32 }
 0x346   :  { %v2273_v39 = vmul.f32 %v2271_v34, %v2263_v36 }
 0x347   :  { %v2282_v40 = vadd.f32 %v2277_v24, %v2272_v38 }
 0x348   :  { %v2283_v41 = vadd.f32 %v2281_v37, %v2273_v39 }
 0x349   :  { %v2284_v42 = vmax.f32 %v2282_v40, 0.0 }
 0x34a   :  { %v2285_v43 = vmax.f32 %v2283_v41, 0.0 }
 0x34b   :  { %v2286_v45 = vpack.c.bf16 %v2284_v42, %v2284_v42 }
 0x34c   :  { %v2287_v44 = vpack.c.bf16 %v2285_v43, %v2285_v43 }
 0x34e   :  { %2448 = vmatprep.mubr.bf16.mxu1 %v2287_v44 }
 0x34f   :  { %2449 = vmatmul.mubr.bf16.vlgmr.msra.gmra.mrb[8].mxu1 %v2286_v45 }
 0x350   :  { %2941 = vmatpush3.bf16.msra.mxu1 %v3411_v46  ;;  %2956 = vmatprep.mubr.msk.bf16.mxu1 %vm3562_vm1, %v3561_v47 }
 0x351   :  { %2942 = vmatprep.subr.bf16.mxu1 %v3561_v47 }
 0x354   :  { %2943 = vmatpush3.bf16.msra.mxu1 %v3412_v48 }
 0x355   :  { %2944 = vmatprep.subr.bf16.mxu1 %v3561_v47 }
 0x358   :  { %2945 = vmatpush3.bf16.msra.mxu1 %v3413_v49 }
 0x359   :  { %2946 = vmatprep.subr.bf16.mxu1 %v3561_v47 }
 0x35c   :  { %2947 = vmatpush3.bf16.msra.mxu1 %v3414_v12 }
 0x35d   :  { %2948 = vmatprep.subr.bf16.mxu1 %v3561_v47 }
 0x360   :  { %2949 = vmatpush3.bf16.msra.mxu1 %v3415_v50 }
 0x361   :  { %2950 = vmatprep.subr.bf16.mxu1 %v3561_v47 }
 0x364   :  { %2951 = vmatpush3.bf16.msra.mxu1 %v3416_v51 }
 0x365   :  { %2952 = vmatprep.subr.bf16.mxu1 %v3561_v47 }
 0x368   :  { %2953 = vmatpush3.bf16.msra.mxu1 %v3417_v52 }
 0x369   :  { %2954 = vmatprep.subr.bf16.mxu1 %v3561_v47 }
 0x36c   :  { %2955 = vmatpush3.bf16.msra.mxu1 %v3418_v53 }
 0x422   :  { %v2925_v0 = vpop.f32.mrb[8].mxu1 }
 0x423   :  { %v2926_v54 = vpop.f32.mrb[9].mxu1 }
 0x424   :  { %v2927_v55 = vadd.f32 %v2926_v54, %v2925_v0  ;;  %v2928_v29 = vpop.f32.mrb[10].mxu1 }
 0x425   :  { %v2929_v57 = vpop.f32.mrb[11].mxu1 }
 0x426   :  { %v2456_v59 = vrot.slane %v2927_v55, 4  ;;  %v2463_v61 = vmul.f32 %v2927_v55, %v2927_v55 }
 0x428   :  { %v2457_v62 = vadd.f32 %v2927_v55, %v2456_v59  ;;  %v2464_v63 = vrot.slane %v2463_v61, 4 }
 0x42a   :  { %v2458_v1 = vrot.slane %v2457_v62, 2  ;;  %v2465_v2 = vadd.f32 %v2464_v63, %v2463_v61 }
 0x42c   :  { %v2459_v3 = vadd.f32 %v2458_v1, %v2457_v62  ;;  %v2466_v4 = vrot.slane %v2465_v2, 2 }
 0x42e   :  { %v2460_v5 = vrot.slane %v2459_v3, 1  ;;  %v2467_v6 = vadd.f32 %v2466_v4, %v2465_v2 }
 0x430   :  { %v2461_v7 = vadd.f32 %v2460_v5, %v2459_v3  ;;  %v2468_v8 = vrot.slane %v2467_v6, 1 }
 0x432   :  { %v2462_v9 = vmul.f32 0.125, %v2461_v7  ;;  %v2469_v11 = vadd.f32 %v2468_v8, %v2467_v6 }
 0x434   :  { %v2470_v13 = vmul.f32 0.125, %v2469_v11  ;;  %v2471_v14 = vmul.f32 %v2462_v9, %v2462_v9  ;;  %v2474_v21 = vsub.f32 %v2927_v55, %v2462_v9 }
 0x436   :  { %v2472_v15 = vsub.f32 %v2470_v13, %v2471_v14 }
 0x438   :  { %v2473_v17 = vmax.f32 %v2472_v15, 0.0 }
 0x43a   :  { %v2475_v18 = vadd.f32 1e-05, %v2473_v17 }
 0x43c   :  { %3431 = vrsqrt.f32 %v2475_v18 }
 0x446   :  { %v3432_v23 = vpop.eup %3431 }
 0x447   :  { %v2477_v25 = vmul.f32 %v3432_v23, %v2474_v21 }
 0x449   :  { %v2482_v27 = vmul.f32 %v2481_v16, %v2477_v25 }
 0x44b   :  { %v2487_v28 = vadd.f32 %v2486_v26, %v2482_v27 }
 0x44d   :  { %v2488_v30 = vmax.f32 %v2487_v28, 0.0 }
 0x44f   :  { %v2489_v31 = vpack.c.bf16 %v2488_v30, %v2488_v30 }
 0x451   :  { %2957 = vmatmul.mubr.bf16.vlgmr.msra.gmra.mrb[12].mxu1 %v2489_v31 }
 0x524   :  { %v2592_v22 = vpop.f32.mrb[12].mxu1 }
 0x525   :  { %v2593_v33 = vadd.f32 %v2592_v22, %v2509_v56  ;;  %v2958_v34 = vpop.f32.mrb[13].mxu1 }
 0x526   :  { %v2595_v35 = vpop.f32.mrb[14].mxu1 }
 0x527   :  { %2598 = vst [vmem:[#allocation10] sm:$0xff] %v2593_v33  ;;  %v2959_v58 = vpop.f32.mrb[15].mxu1 }
 0x528   :  { %3533 = shalt.err (!%p3530_p8)
}
 0x529   :  { %s3534_s4 = scalar_lea.hbm %s3956_s6, 128 }
 0x52a   :  { %p3535_p9 = scmp.ne.s32.totalorder %s3956_s6, %s3534_s4  ;;  %p3538_p10 = scmp.lt.u32.totalorder %s3534_s4, %s3956_s6 }
 0x52c   :  { %p3540_p11 = pnand %p3538_p10, %p3535_p9 }
 0x52e   :  { %3543 = shalt.err (!%p3540_p11)
}
 0x52f   :  { %2608 = dma.vmem_to_hbm [thread:$0]  %s2606_s19, 128, %s3956_s6, [#allocation4]  }
 0x530   :  { %3550 = dma.done.wait [#allocation4], 128  }
 0x531   :  { %3551 = vsyncadd [#allocation4], 4294967168 }
 0x532   :  { %2612 = vsyncpa [#allocation3], 1 }
 0x533   :  { %2613 = vsyncpa [#allocation6], 1 }
 0x534   :  { %2614 = vsyncpa [#allocation9], 1 }
 0x535   :  { %2615 = vsyncpa [#allocation4], 1 }

</bundles_post_ra>
